<compile_context>
chip_gen: v7x
topology: tpu7x:2x2x1
jax: 0.10.0
libtpu: 0.0.40
codegen_flags: <defaults>
</compile_context>

<pallas_src>
import functools

import jax
import jax.numpy as jnp
import numpy as np
from jax.experimental import pallas as pl
from jax.experimental.pallas import tpu as pltpu


def _apply_act(y, act):
    if act in ("Relu", "R"):
        return jnp.maximum(y, 0.0)
    if act in ("Linear", "L"):
        return y
    if act in ("Hardswish", "H"):
        return y * jnp.clip(y + 3.0, 0.0, 6.0) * (1.0 / 6.0)
    if act in ("Tanh", "T"):
        return jnp.tanh(y)
    raise ValueError(f"unknown act {act!r}")


def _deconv_kernel(x_ref, at_ref, bt_ref, wdw_ref, o1_ref,
                   w1_ref, b1_ref, w2_ref, b2_ref, wp_ref, o2_ref,
                   out_ref, *, act):
    Nb, C, H, W = x_ref.shape
    O = out_ref.shape[1]
    HW = H * W
    f32 = jnp.float32
    bf16 = jnp.bfloat16

    # ---- fused bilinear x2 upsample + depthwise 3x3 / stride-2 / pad-1 ----
    # Phase A: contract H against the stacked 3-dh-tap geometry matrix At (H, 3H).
    x = x_ref[...].reshape(Nb * C, H, W)                      # bf16 from the wrapper
    xt = jnp.swapaxes(x, -1, -2)                              # (Nb*C, W, H) bf16 transpose
    xh = jnp.dot(xt.reshape(Nb * C * W, H), at_ref[...],
                 preferred_element_type=f32)                  # (Nb*C*W, 3H) f32
    # Cast before the mid-pipeline transpose so only bf16 bytes get relaid out.
    xh = jnp.swapaxes(xh.astype(bf16).reshape(Nb * C, W, 3 * H), -1, -2)
    taps = xh.reshape(Nb, C, 3, H, W)                         # dh = free leading index

    # Phase B: per-channel dh-combine (BN1 scale pre-folded into wdw) *before*
    # the W contraction, then 3 lane-dense (W, W) matmuls (one per dw tap).
    acc = None
    for dw in range(3):
        s = None
        for dh in range(3):
            term = taps[:, :, dh] * wdw_ref[dh, dw]           # (C,1,1) splat, f32 accum
            s = term if s is None else s + term
        s2d = s.astype(bf16).reshape(Nb * C * H, W)
        part = jnp.dot(s2d, bt_ref[dw], preferred_element_type=f32)  # (Nb*C*H, W) f32
        acc = part if acc is None else acc + part

    y = _apply_act(acc.reshape(Nb, C, H, W) + o1_ref[...], act)      # (Nb, C, H, W) f32

    # ---- SE block on the VPU (tiny K=C / K=Cmid contractions, no MXU stalls) ----
    pool = jnp.sum(jnp.sum(y, axis=-1), axis=-1) * (1.0 / HW)        # (Nb, C)
    z1 = jnp.maximum(
        jnp.sum(pool[:, None, :] * w1_ref[...], axis=-1) + b1_ref[...], 0.0)   # (Nb, Cmid)
    z2 = jnp.sum(z1[:, None, :] * w2_ref[...], axis=-1) + b2_ref[...]          # (Nb, C)
    gate = jnp.clip(z2 * (1.0 / 6.0) + 0.5, 0.0, 1.0)                # hardsigmoid

    # ---- 1x1 pointwise conv (BN2 scale folded; per-image SE gate folded into
    #      the (O, C) weights) as one batched, lane-dense matmul ----
    yg = y.astype(bf16).reshape(Nb, C, HW)                           # lane axis = H*W
    wp_g = (wp_ref[...][None, :, :] * gate[:, None, :]).astype(bf16)  # (Nb, O, C)
    out = jnp.einsum('noc,ncs->nos', wp_g, yg, preferred_element_type=f32)
    out_ref[...] = _apply_act(out + o2_ref[...][None], act).astype(out_ref.dtype)


def _bilinear_matrix(n_in):
    """(2n, n) interpolation matrix for Upsample(x2, bilinear, align_corners=True)."""
    n_out = 2 * n_in
    if n_in == 1:
        return np.ones((n_out, 1), np.float32)
    U = np.zeros((n_out, n_in), np.float32)
    scale = (n_in - 1) / (n_out - 1)
    for i in range(n_out):
        s = i * scale
        i0 = int(np.floor(s))
        i1 = min(i0 + 1, n_in - 1)
        f = s - i0
        U[i, i0] += 1.0 - f
        U[i, i1] += f
    return U


def _tap_matrices(n_in):
    """Fused (upsample x2) + (stride-2, pad-1, 3-tap selection) matrices: (3, n, n)."""
    U = _bilinear_matrix(n_in)          # (2n, n)
    n_up = 2 * n_in
    n_out = n_in                        # floor((2n + 2 - 3)/2) + 1 == n
    mats = []
    for d in range(3):
        S = np.zeros((n_out, n_up), np.float32)
        for h in range(n_out):
            j = 2 * h + d - 1           # padded-by-1 coordinate
            if 0 <= j < n_up:
                S[h, j] = 1.0
        mats.append(S @ U)
    return np.stack(mats, axis=0).astype(np.float32)


def _vmem_capacity_bytes():
    try:
        return int(pltpu.get_tpu_info().vmem_capacity_bytes)
    except Exception:
        return 64 << 20                 # conservative default (v7x per-TC VMEM)


def _pick_images_per_step(n, per_image_bytes, budget_bytes):
    """Largest divisor of n whose working set fits the budget, preferring >= 2
    grid steps so the batch axis can shard across both v7x TensorCores."""
    divisors = [d for d in range(1, n + 1) if n % d == 0]
    fits = [d for d in divisors if d * per_image_bytes <= budget_bytes] or [1]
    two_step = [d for d in fits if n // d >= 2]
    return max(two_step) if two_step else max(fits)


def init_deconv_params(key, in_channels, out_channels):
    C = in_channels
    Cmid = C // 2
    ks = jax.random.split(key, 14)
    nrm = lambda k, shape, s=0.1: s * jax.random.normal(k, shape, jnp.float32)
    p = {}
    # depthwise 3x3 conv weight, stored as (3, 3, C)  (torch: (C, 1, 3, 3))
    p["w_dw"] = nrm(ks[0], (3, 3, C), 0.3)
    # BN1 (inference mode, synthetic running stats)
    p["bn1_gamma"] = 1.0 + 0.1 * jax.random.normal(ks[1], (C,), jnp.float32)
    p["bn1_beta"] = nrm(ks[2], (C,))
    p["bn1_mean"] = nrm(ks[3], (C,))
    p["bn1_var"] = jnp.abs(nrm(ks[4], (C,))) + 1.0
    # SE block (1x1 convs with bias)
    p["se_w1"] = nrm(ks[5], (Cmid, C), 0.3)
    p["se_b1"] = nrm(ks[6], (Cmid, 1))
    p["se_w2"] = nrm(ks[7], (C, Cmid), 0.3)
    p["se_b2"] = nrm(ks[8], (C, 1))
    # 1x1 pointwise conv weight (torch: (O, C, 1, 1))
    p["w_pw"] = nrm(ks[9], (out_channels, C), 0.3)
    # BN2
    p["bn2_gamma"] = 1.0 + 0.1 * jax.random.normal(ks[10], (out_channels,), jnp.float32)
    p["bn2_beta"] = nrm(ks[11], (out_channels,))
    p["bn2_mean"] = nrm(ks[12], (out_channels,))
    p["bn2_var"] = jnp.abs(nrm(ks[13], (out_channels,))) + 1.0
    return p


def deconv_forward(x_nchw, params, act="Relu", up_dim=1):
    if up_dim != 1:
        # TODO(synk): up_dim>1 adds an extra 1x1 ConBNAct between the upsample and
        # the depthwise conv; only the module default up_dim=1 is implemented.
        raise NotImplementedError("up_dim > 1 not implemented")

    N, C, H, W = x_nchw.shape
    O = params["w_pw"].shape[0]
    Cmid = params["se_w1"].shape[0]
    eps = 1e-3
    HW = H * W

    # Fold BatchNorm (inference mode) scales into the conv weights; only the
    # per-channel offsets remain.
    s1 = params["bn1_gamma"] / jnp.sqrt(params["bn1_var"] + eps)
    o1 = params["bn1_beta"] - params["bn1_mean"] * s1
    s2 = params["bn2_gamma"] / jnp.sqrt(params["bn2_var"] + eps)
    o2 = params["bn2_beta"] - params["bn2_mean"] * s2

    # TODO(synk): for very large C/O a lane-major (9, C)/(1, C) layout would avoid
    # the (..,1,1) VMEM row padding of these constants; the splat-friendly layout
    # is kept here because its lowering is proven.
    w_dw = (params["w_dw"] * s1[None, None, :]).reshape(3, 3, C, 1, 1)   # BN1 scale folded
    w_pw = params["w_pw"] * s2[:, None]                                   # BN2 scale folded

    # Fused (upsample x2 + 3-tap / stride-2) geometry matrices, bf16 MXU operands
    # (accumulation stays f32 in-kernel).  Keep these f32 if bit-closeness to the
    # f32 torch reference matters more than bandwidth.
    At = jnp.asarray(np.concatenate([m.T for m in _tap_matrices(H)], axis=1),
                     dtype=jnp.bfloat16)                                  # (H, 3H) stacked dh
    Bt3 = jnp.asarray(np.stack([m.T for m in _tap_matrices(W)], axis=0),
                      dtype=jnp.bfloat16)                                 # (3, W, W) per-dw

    # x is only consumed as an MXU operand: stream it in bf16 (halves input DMA).
    x = x_nchw.astype(jnp.bfloat16)

    # --- generation-aware block sizing from the per-step working set ---
    vmem_cap = _vmem_capacity_bytes()
    budget = max(4 << 20, min(int(vmem_cap * 0.45), 96 << 20))
    # rough per-image bytes: double-buffered bf16 input + bf16/f32 intermediates
    # (peak ~3-4x of the x block) + y + double-buffered f32 output.
    per_image = HW * (60 * C + 12 * O)
    Nb = _pick_images_per_step(N, per_image, budget)
    const_bytes = ((3 * H * H + 3 * W * W) * 2        # At, Bt3 (bf16)
                   + 10 * C * 4096                    # wdw/o1 padded (..,1,1) rows
                   + (O + Cmid) * 1024                # o2, biases
                   + (2 * Cmid * C + O * C) * 4)      # SE / pointwise weights
    need = Nb * per_image + const_bytes + (2 << 20)
    vmem_limit = int(min(max(need, 16 << 20), max(int(vmem_cap * 0.9), 16 << 20)))

    grid = (N // Nb,)

    def const_spec(shape):
        nd = len(shape)
        return pl.BlockSpec(shape, lambda n, _nd=nd: (0,) * _nd)

    out = pl.pallas_call(
        functools.partial(_deconv_kernel, act=act),
        out_shape=jax.ShapeDtypeStruct((N, O, HW), jnp.float32),
        grid=grid,
        in_specs=[
            pl.BlockSpec((Nb, C, H, W), lambda n: (n, 0, 0, 0)),   # x block (bf16)
            const_spec((H, 3 * H)),          # At  (stacked dh taps, bf16)
            const_spec((3, W, W)),           # Bt3 (per-dw taps, bf16)
            const_spec((3, 3, C, 1, 1)),     # depthwise taps (BN1 scale folded)
            const_spec((C, 1, 1)),           # BN1 offset
            const_spec((Cmid, C)),           # SE conv1 weight
            const_spec((1, Cmid)),           # SE conv1 bias
            const_spec((C, Cmid)),           # SE conv2 weight
            const_spec((1, C)),              # SE conv2 bias
            const_spec((O, C)),              # pointwise weight (BN2 scale folded)
            const_spec((O, 1)),              # BN2 offset
        ],
        out_specs=pl.BlockSpec((Nb, O, HW), lambda n: (n, 0, 0)),  # lane-dense output
        compiler_params=pltpu.CompilerParams(
            dimension_semantics=("parallel",),
            vmem_limit_bytes=vmem_limit,
        ),
    )(x, At, Bt3, w_dw, o1.reshape(C, 1, 1),
      params["se_w1"], params["se_b1"].reshape(1, Cmid),
      params["se_w2"], params["se_b2"].reshape(1, C),
      w_pw, o2.reshape(O, 1))

    return out.reshape(N, O, H, W)   # NCHW


if __name__ == "__main__":
    key = jax.random.PRNGKey(0)
    k_x, k_p = jax.random.split(key)

    N, C, H, W = 2, 4, 16, 16
    out_channels = 8

    x = jax.random.normal(k_x, (N, C, H, W), jnp.float32)
    params = init_deconv_params(k_p, C, out_channels)

    y = deconv_forward(x, params, act="Relu", up_dim=1)
    y = jax.block_until_ready(y)

    assert y.shape == (N, out_channels, H, W), y.shape
    assert bool(jnp.all(jnp.isfinite(y)))
    print("KERNEL_OK")
</pallas_src>

<mosaic_0001>
module attributes {stable_mosaic.version = 11 : i64} {
  func.func @_deconv_kernel(%arg0: i32, %arg1: memref<1x4x16x16xbf16, #tpu.memory_space<vmem>>, %arg2: memref<16x48xbf16, #tpu.memory_space<vmem>>, %arg3: memref<3x16x16xbf16, #tpu.memory_space<vmem>>, %arg4: memref<3x3x4x1x1xf32, #tpu.memory_space<vmem>>, %arg5: memref<4x1x1xf32, #tpu.memory_space<vmem>>, %arg6: memref<2x4xf32, #tpu.memory_space<vmem>>, %arg7: memref<1x2xf32, #tpu.memory_space<vmem>>, %arg8: memref<4x2xf32, #tpu.memory_space<vmem>>, %arg9: memref<1x4xf32, #tpu.memory_space<vmem>>, %arg10: memref<8x4xf32, #tpu.memory_space<vmem>>, %arg11: memref<8x1xf32, #tpu.memory_space<vmem>>, %arg12: memref<1x8x256xf32, #tpu.memory_space<vmem>>) attributes {dimension_semantics = [#tpu.dimension_semantics<parallel>], iteration_bounds = array<i64: 2>, scalar_prefetch = 0 : i64, scratch_operands = 0 : i64, tpu.core_type = #tpu.core_type<tc>, window_params = [{transform_indices = @transform_0, window_bounds = array<i64: 1, 4, 16, 16>}, {pipeline_mode = #tpu.pipeline_mode<synchronous>, transform_indices = @transform_1, window_bounds = array<i64: 16, 48>}, {pipeline_mode = #tpu.pipeline_mode<synchronous>, transform_indices = @transform_2, window_bounds = array<i64: 3, 16, 16>}, {pipeline_mode = #tpu.pipeline_mode<synchronous>, transform_indices = @transform_3, window_bounds = array<i64: 3, 3, 4, 1, 1>}, {pipeline_mode = #tpu.pipeline_mode<synchronous>, transform_indices = @transform_4, window_bounds = array<i64: 4, 1, 1>}, {pipeline_mode = #tpu.pipeline_mode<synchronous>, transform_indices = @transform_5, window_bounds = array<i64: 2, 4>}, {pipeline_mode = #tpu.pipeline_mode<synchronous>, transform_indices = @transform_6, window_bounds = array<i64: 1, 2>}, {pipeline_mode = #tpu.pipeline_mode<synchronous>, transform_indices = @transform_7, window_bounds = array<i64: 4, 2>}, {pipeline_mode = #tpu.pipeline_mode<synchronous>, transform_indices = @transform_8, window_bounds = array<i64: 1, 4>}, {pipeline_mode = #tpu.pipeline_mode<synchronous>, transform_indices = @transform_9, window_bounds = array<i64: 8, 4>}, {pipeline_mode = #tpu.pipeline_mode<synchronous>, transform_indices = @transform_10, window_bounds = array<i64: 8, 1>}, {transform_indices = @transform_11, window_bounds = array<i64: 1, 8, 256>}]} {
    %c0 = arith.constant 0 : index
    %c0_0 = arith.constant 0 : index
    %c0_1 = arith.constant 0 : index
    %c0_2 = arith.constant 0 : index
    %0 = vector.load %arg1[%c0, %c0_0, %c0_1, %c0_2] : memref<1x4x16x16xbf16, #tpu.memory_space<vmem>>, vector<1x4x16x16xbf16>
    %1 = vector.shape_cast %0 : vector<1x4x16x16xbf16> to vector<4x16x16xbf16>
    %2 = tpu.transpose %1, [0, 2, 1] : vector<4x16x16xbf16> -> vector<4x16x16xbf16>
    %3 = vector.shape_cast %2 : vector<4x16x16xbf16> to vector<64x16xbf16>
    %c0_3 = arith.constant 0 : index
    %c0_4 = arith.constant 0 : index
    %4 = vector.load %arg2[%c0_3, %c0_4] : memref<16x48xbf16, #tpu.memory_space<vmem>>, vector<16x48xbf16>
    %cst = arith.constant dense<0.000000e+00> : vector<64x48xf32>
    %5 = tpu.matmul %3, %4, %cst {dimension_numbers = #tpu.dot_dimension_numbers<[1], [0], [0], [1], [0, 0, 1, 1], [], []>} : vector<64x16xbf16>, vector<16x48xbf16>, vector<64x48xf32> -> vector<64x48xf32>
    %6 = arith.truncf %5 : vector<64x48xf32> to vector<64x48xbf16>
    %7 = vector.shape_cast %6 : vector<64x48xbf16> to vector<4x16x48xbf16>
    %8 = tpu.transpose %7, [0, 2, 1] : vector<4x16x48xbf16> -> vector<4x48x16xbf16>
    %9 = vector.shape_cast %8 : vector<4x48x16xbf16> to vector<1x4x3x16x16xbf16>
    %10 = vector.extract_strided_slice %9 {offsets = [0, 0, 0, 0, 0], sizes = [1, 4, 1, 16, 16], strides = [1, 1, 1, 1, 1]} : vector<1x4x3x16x16xbf16> to vector<1x4x1x16x16xbf16>
    %11 = vector.shape_cast %10 : vector<1x4x1x16x16xbf16> to vector<1x4x16x16xbf16>
    %c0_5 = arith.constant 0 : index
    %c0_6 = arith.constant 0 : index
    %c0_7 = arith.constant 0 : index
    %c0_8 = arith.constant 0 : index
    %c0_9 = arith.constant 0 : index
    %12 = vector.load %arg4[%c0_5, %c0_6, %c0_7, %c0_8, %c0_9] : memref<3x3x4x1x1xf32, #tpu.memory_space<vmem>>, vector<1x1x4x1x1xf32>
    %13 = vector.shape_cast %12 : vector<1x1x4x1x1xf32> to vector<4x1x1xf32>
    %14 = arith.extf %11 : vector<1x4x16x16xbf16> to vector<1x4x16x16xf32>
    %15 = vector.shape_cast %13 : vector<4x1x1xf32> to vector<1x4x1x1xf32>
    %16 = vector.broadcast %15 : vector<1x4x1x1xf32> to vector<1x4x16x16xf32>
    %17 = arith.mulf %14, %16 : vector<1x4x16x16xf32>
    %18 = vector.extract_strided_slice %9 {offsets = [0, 0, 1, 0, 0], sizes = [1, 4, 1, 16, 16], strides = [1, 1, 1, 1, 1]} : vector<1x4x3x16x16xbf16> to vector<1x4x1x16x16xbf16>
    %19 = vector.shape_cast %18 : vector<1x4x1x16x16xbf16> to vector<1x4x16x16xbf16>
    %c1 = arith.constant 1 : index
    %c0_10 = arith.constant 0 : index
    %c0_11 = arith.constant 0 : index
    %c0_12 = arith.constant 0 : index
    %c0_13 = arith.constant 0 : index
    %20 = vector.load %arg4[%c1, %c0_10, %c0_11, %c0_12, %c0_13] : memref<3x3x4x1x1xf32, #tpu.memory_space<vmem>>, vector<1x1x4x1x1xf32>
    %21 = vector.shape_cast %20 : vector<1x1x4x1x1xf32> to vector<4x1x1xf32>
    %22 = arith.extf %19 : vector<1x4x16x16xbf16> to vector<1x4x16x16xf32>
    %23 = vector.shape_cast %21 : vector<4x1x1xf32> to vector<1x4x1x1xf32>
    %24 = vector.broadcast %23 : vector<1x4x1x1xf32> to vector<1x4x16x16xf32>
    %25 = arith.mulf %22, %24 : vector<1x4x16x16xf32>
    %26 = arith.addf %17, %25 : vector<1x4x16x16xf32>
    %27 = vector.extract_strided_slice %9 {offsets = [0, 0, 2, 0, 0], sizes = [1, 4, 1, 16, 16], strides = [1, 1, 1, 1, 1]} : vector<1x4x3x16x16xbf16> to vector<1x4x1x16x16xbf16>
    %28 = vector.shape_cast %27 : vector<1x4x1x16x16xbf16> to vector<1x4x16x16xbf16>
    %c2 = arith.constant 2 : index
    %c0_14 = arith.constant 0 : index
    %c0_15 = arith.constant 0 : index
    %c0_16 = arith.constant 0 : index
    %c0_17 = arith.constant 0 : index
    %29 = vector.load %arg4[%c2, %c0_14, %c0_15, %c0_16, %c0_17] : memref<3x3x4x1x1xf32, #tpu.memory_space<vmem>>, vector<1x1x4x1x1xf32>
    %30 = vector.shape_cast %29 : vector<1x1x4x1x1xf32> to vector<4x1x1xf32>
    %31 = arith.extf %28 : vector<1x4x16x16xbf16> to vector<1x4x16x16xf32>
    %32 = vector.shape_cast %30 : vector<4x1x1xf32> to vector<1x4x1x1xf32>
    %33 = vector.broadcast %32 : vector<1x4x1x1xf32> to vector<1x4x16x16xf32>
    %34 = arith.mulf %31, %33 : vector<1x4x16x16xf32>
    %35 = arith.addf %26, %34 : vector<1x4x16x16xf32>
    %36 = arith.truncf %35 : vector<1x4x16x16xf32> to vector<1x4x16x16xbf16>
    %37 = vector.shape_cast %36 : vector<1x4x16x16xbf16> to vector<64x16xbf16>
    %c0_18 = arith.constant 0 : index
    %c0_19 = arith.constant 0 : index
    %c0_20 = arith.constant 0 : index
    %38 = vector.load %arg3[%c0_18, %c0_19, %c0_20] : memref<3x16x16xbf16, #tpu.memory_space<vmem>>, vector<1x16x16xbf16>
    %39 = vector.shape_cast %38 : vector<1x16x16xbf16> to vector<16x16xbf16>
    %cst_21 = arith.constant dense<0.000000e+00> : vector<64x16xf32>
    %40 = tpu.matmul %37, %39, %cst_21 {dimension_numbers = #tpu.dot_dimension_numbers<[1], [0], [0], [1], [0, 0, 1, 1], [], []>} : vector<64x16xbf16>, vector<16x16xbf16>, vector<64x16xf32> -> vector<64x16xf32>
    %41 = vector.extract_strided_slice %9 {offsets = [0, 0, 0, 0, 0], sizes = [1, 4, 1, 16, 16], strides = [1, 1, 1, 1, 1]} : vector<1x4x3x16x16xbf16> to vector<1x4x1x16x16xbf16>
    %42 = vector.shape_cast %41 : vector<1x4x1x16x16xbf16> to vector<1x4x16x16xbf16>
    %c0_22 = arith.constant 0 : index
    %c1_23 = arith.constant 1 : index
    %c0_24 = arith.constant 0 : index
    %c0_25 = arith.constant 0 : index
    %c0_26 = arith.constant 0 : index
    %43 = vector.load %arg4[%c0_22, %c1_23, %c0_24, %c0_25, %c0_26] : memref<3x3x4x1x1xf32, #tpu.memory_space<vmem>>, vector<1x1x4x1x1xf32>
    %44 = vector.shape_cast %43 : vector<1x1x4x1x1xf32> to vector<4x1x1xf32>
    %45 = arith.extf %42 : vector<1x4x16x16xbf16> to vector<1x4x16x16xf32>
    %46 = vector.shape_cast %44 : vector<4x1x1xf32> to vector<1x4x1x1xf32>
    %47 = vector.broadcast %46 : vector<1x4x1x1xf32> to vector<1x4x16x16xf32>
    %48 = arith.mulf %45, %47 : vector<1x4x16x16xf32>
    %49 = vector.extract_strided_slice %9 {offsets = [0, 0, 1, 0, 0], sizes = [1, 4, 1, 16, 16], strides = [1, 1, 1, 1, 1]} : vector<1x4x3x16x16xbf16> to vector<1x4x1x16x16xbf16>
    %50 = vector.shape_cast %49 : vector<1x4x1x16x16xbf16> to vector<1x4x16x16xbf16>
    %c1_27 = arith.constant 1 : index
    %c1_28 = arith.constant 1 : index
    %c0_29 = arith.constant 0 : index
    %c0_30 = arith.constant 0 : index
    %c0_31 = arith.constant 0 : index
    %51 = vector.load %arg4[%c1_27, %c1_28, %c0_29, %c0_30, %c0_31] : memref<3x3x4x1x1xf32, #tpu.memory_space<vmem>>, vector<1x1x4x1x1xf32>
    %52 = vector.shape_cast %51 : vector<1x1x4x1x1xf32> to vector<4x1x1xf32>
    %53 = arith.extf %50 : vector<1x4x16x16xbf16> to vector<1x4x16x16xf32>
    %54 = vector.shape_cast %52 : vector<4x1x1xf32> to vector<1x4x1x1xf32>
    %55 = vector.broadcast %54 : vector<1x4x1x1xf32> to vector<1x4x16x16xf32>
    %56 = arith.mulf %53, %55 : vector<1x4x16x16xf32>
    %57 = arith.addf %48, %56 : vector<1x4x16x16xf32>
    %58 = vector.extract_strided_slice %9 {offsets = [0, 0, 2, 0, 0], sizes = [1, 4, 1, 16, 16], strides = [1, 1, 1, 1, 1]} : vector<1x4x3x16x16xbf16> to vector<1x4x1x16x16xbf16>
    %59 = vector.shape_cast %58 : vector<1x4x1x16x16xbf16> to vector<1x4x16x16xbf16>
    %c2_32 = arith.constant 2 : index
    %c1_33 = arith.constant 1 : index
    %c0_34 = arith.constant 0 : index
    %c0_35 = arith.constant 0 : index
    %c0_36 = arith.constant 0 : index
    %60 = vector.load %arg4[%c2_32, %c1_33, %c0_34, %c0_35, %c0_36] : memref<3x3x4x1x1xf32, #tpu.memory_space<vmem>>, vector<1x1x4x1x1xf32>
    %61 = vector.shape_cast %60 : vector<1x1x4x1x1xf32> to vector<4x1x1xf32>
    %62 = arith.extf %59 : vector<1x4x16x16xbf16> to vector<1x4x16x16xf32>
    %63 = vector.shape_cast %61 : vector<4x1x1xf32> to vector<1x4x1x1xf32>
    %64 = vector.broadcast %63 : vector<1x4x1x1xf32> to vector<1x4x16x16xf32>
    %65 = arith.mulf %62, %64 : vector<1x4x16x16xf32>
    %66 = arith.addf %57, %65 : vector<1x4x16x16xf32>
    %67 = arith.truncf %66 : vector<1x4x16x16xf32> to vector<1x4x16x16xbf16>
    %68 = vector.shape_cast %67 : vector<1x4x16x16xbf16> to vector<64x16xbf16>
    %c1_37 = arith.constant 1 : index
    %c0_38 = arith.constant 0 : index
    %c0_39 = arith.constant 0 : index
    %69 = vector.load %arg3[%c1_37, %c0_38, %c0_39] : memref<3x16x16xbf16, #tpu.memory_space<vmem>>, vector<1x16x16xbf16>
    %70 = vector.shape_cast %69 : vector<1x16x16xbf16> to vector<16x16xbf16>
    %cst_40 = arith.constant dense<0.000000e+00> : vector<64x16xf32>
    %71 = tpu.matmul %68, %70, %cst_40 {dimension_numbers = #tpu.dot_dimension_numbers<[1], [0], [0], [1], [0, 0, 1, 1], [], []>} : vector<64x16xbf16>, vector<16x16xbf16>, vector<64x16xf32> -> vector<64x16xf32>
    %72 = arith.addf %40, %71 : vector<64x16xf32>
    %73 = vector.extract_strided_slice %9 {offsets = [0, 0, 0, 0, 0], sizes = [1, 4, 1, 16, 16], strides = [1, 1, 1, 1, 1]} : vector<1x4x3x16x16xbf16> to vector<1x4x1x16x16xbf16>
    %74 = vector.shape_cast %73 : vector<1x4x1x16x16xbf16> to vector<1x4x16x16xbf16>
    %c0_41 = arith.constant 0 : index
    %c2_42 = arith.constant 2 : index
    %c0_43 = arith.constant 0 : index
    %c0_44 = arith.constant 0 : index
    %c0_45 = arith.constant 0 : index
    %75 = vector.load %arg4[%c0_41, %c2_42, %c0_43, %c0_44, %c0_45] : memref<3x3x4x1x1xf32, #tpu.memory_space<vmem>>, vector<1x1x4x1x1xf32>
    %76 = vector.shape_cast %75 : vector<1x1x4x1x1xf32> to vector<4x1x1xf32>
    %77 = arith.extf %74 : vector<1x4x16x16xbf16> to vector<1x4x16x16xf32>
    %78 = vector.shape_cast %76 : vector<4x1x1xf32> to vector<1x4x1x1xf32>
    %79 = vector.broadcast %78 : vector<1x4x1x1xf32> to vector<1x4x16x16xf32>
    %80 = arith.mulf %77, %79 : vector<1x4x16x16xf32>
    %81 = vector.extract_strided_slice %9 {offsets = [0, 0, 1, 0, 0], sizes = [1, 4, 1, 16, 16], strides = [1, 1, 1, 1, 1]} : vector<1x4x3x16x16xbf16> to vector<1x4x1x16x16xbf16>
    %82 = vector.shape_cast %81 : vector<1x4x1x16x16xbf16> to vector<1x4x16x16xbf16>
    %c1_46 = arith.constant 1 : index
    %c2_47 = arith.constant 2 : index
    %c0_48 = arith.constant 0 : index
    %c0_49 = arith.constant 0 : index
    %c0_50 = arith.constant 0 : index
    %83 = vector.load %arg4[%c1_46, %c2_47, %c0_48, %c0_49, %c0_50] : memref<3x3x4x1x1xf32, #tpu.memory_space<vmem>>, vector<1x1x4x1x1xf32>
    %84 = vector.shape_cast %83 : vector<1x1x4x1x1xf32> to vector<4x1x1xf32>
    %85 = arith.extf %82 : vector<1x4x16x16xbf16> to vector<1x4x16x16xf32>
    %86 = vector.shape_cast %84 : vector<4x1x1xf32> to vector<1x4x1x1xf32>
    %87 = vector.broadcast %86 : vector<1x4x1x1xf32> to vector<1x4x16x16xf32>
    %88 = arith.mulf %85, %87 : vector<1x4x16x16xf32>
    %89 = arith.addf %80, %88 : vector<1x4x16x16xf32>
    %90 = vector.extract_strided_slice %9 {offsets = [0, 0, 2, 0, 0], sizes = [1, 4, 1, 16, 16], strides = [1, 1, 1, 1, 1]} : vector<1x4x3x16x16xbf16> to vector<1x4x1x16x16xbf16>
    %91 = vector.shape_cast %90 : vector<1x4x1x16x16xbf16> to vector<1x4x16x16xbf16>
    %c2_51 = arith.constant 2 : index
    %c2_52 = arith.constant 2 : index
    %c0_53 = arith.constant 0 : index
    %c0_54 = arith.constant 0 : index
    %c0_55 = arith.constant 0 : index
    %92 = vector.load %arg4[%c2_51, %c2_52, %c0_53, %c0_54, %c0_55] : memref<3x3x4x1x1xf32, #tpu.memory_space<vmem>>, vector<1x1x4x1x1xf32>
    %93 = vector.shape_cast %92 : vector<1x1x4x1x1xf32> to vector<4x1x1xf32>
    %94 = arith.extf %91 : vector<1x4x16x16xbf16> to vector<1x4x16x16xf32>
    %95 = vector.shape_cast %93 : vector<4x1x1xf32> to vector<1x4x1x1xf32>
    %96 = vector.broadcast %95 : vector<1x4x1x1xf32> to vector<1x4x16x16xf32>
    %97 = arith.mulf %94, %96 : vector<1x4x16x16xf32>
    %98 = arith.addf %89, %97 : vector<1x4x16x16xf32>
    %99 = arith.truncf %98 : vector<1x4x16x16xf32> to vector<1x4x16x16xbf16>
    %100 = vector.shape_cast %99 : vector<1x4x16x16xbf16> to vector<64x16xbf16>
    %c2_56 = arith.constant 2 : index
    %c0_57 = arith.constant 0 : index
    %c0_58 = arith.constant 0 : index
    %101 = vector.load %arg3[%c2_56, %c0_57, %c0_58] : memref<3x16x16xbf16, #tpu.memory_space<vmem>>, vector<1x16x16xbf16>
    %102 = vector.shape_cast %101 : vector<1x16x16xbf16> to vector<16x16xbf16>
    %cst_59 = arith.constant dense<0.000000e+00> : vector<64x16xf32>
    %103 = tpu.matmul %100, %102, %cst_59 {dimension_numbers = #tpu.dot_dimension_numbers<[1], [0], [0], [1], [0, 0, 1, 1], [], []>} : vector<64x16xbf16>, vector<16x16xbf16>, vector<64x16xf32> -> vector<64x16xf32>
    %104 = arith.addf %72, %103 : vector<64x16xf32>
    %105 = vector.shape_cast %104 : vector<64x16xf32> to vector<1x4x16x16xf32>
    %c0_60 = arith.constant 0 : index
    %c0_61 = arith.constant 0 : index
    %c0_62 = arith.constant 0 : index
    %106 = vector.load %arg5[%c0_60, %c0_61, %c0_62] : memref<4x1x1xf32, #tpu.memory_space<vmem>>, vector<4x1x1xf32>
    %107 = vector.shape_cast %106 : vector<4x1x1xf32> to vector<1x4x1x1xf32>
    %108 = vector.broadcast %107 : vector<1x4x1x1xf32> to vector<1x4x16x16xf32>
    %109 = arith.addf %105, %108 : vector<1x4x16x16xf32>
    %cst_63 = arith.constant 0.000000e+00 : f32
    %110 = vector.broadcast %cst_63 : f32 to vector<1x4x16x16xf32>
    %111 = arith.maximumf %109, %110 : vector<1x4x16x16xf32>
    %cst_64 = arith.constant dense<0.000000e+00> : vector<1x4x16xf32>
    %112 = vector.multi_reduction <add>, %111, %cst_64 [3] : vector<1x4x16x16xf32> to vector<1x4x16xf32>
    %cst_65 = arith.constant dense<0.000000e+00> : vector<1x4xf32>
    %113 = vector.multi_reduction <add>, %112, %cst_65 [2] : vector<1x4x16xf32> to vector<1x4xf32>
    %cst_66 = arith.constant 3.906250e-03 : f32
    %114 = vector.broadcast %cst_66 : f32 to vector<1x4xf32>
    %115 = arith.mulf %113, %114 : vector<1x4xf32>
    %116 = vector.shape_cast %115 : vector<1x4xf32> to vector<1x1x4xf32>
    %c0_67 = arith.constant 0 : index
    %c0_68 = arith.constant 0 : index
    %117 = vector.load %arg6[%c0_67, %c0_68] : memref<2x4xf32, #tpu.memory_space<vmem>>, vector<2x4xf32>
    %118 = vector.shape_cast %117 : vector<2x4xf32> to vector<1x2x4xf32>
    %119 = vector.broadcast %116 : vector<1x1x4xf32> to vector<1x2x4xf32>
    %120 = arith.mulf %119, %118 : vector<1x2x4xf32>
    %cst_69 = arith.constant dense<0.000000e+00> : vector<1x2xf32>
    %121 = vector.multi_reduction <add>, %120, %cst_69 [2] : vector<1x2x4xf32> to vector<1x2xf32>
    %c0_70 = arith.constant 0 : index
    %c0_71 = arith.constant 0 : index
    %122 = vector.load %arg7[%c0_70, %c0_71] : memref<1x2xf32, #tpu.memory_space<vmem>>, vector<1x2xf32>
    %123 = arith.addf %121, %122 : vector<1x2xf32>
    %cst_72 = arith.constant 0.000000e+00 : f32
    %124 = vector.broadcast %cst_72 : f32 to vector<1x2xf32>
    %125 = arith.maximumf %123, %124 : vector<1x2xf32>
    %126 = vector.shape_cast %125 : vector<1x2xf32> to vector<1x1x2xf32>
    %c0_73 = arith.constant 0 : index
    %c0_74 = arith.constant 0 : index
    %127 = vector.load %arg8[%c0_73, %c0_74] : memref<4x2xf32, #tpu.memory_space<vmem>>, vector<4x2xf32>
    %128 = vector.shape_cast %127 : vector<4x2xf32> to vector<1x4x2xf32>
    %129 = vector.broadcast %126 : vector<1x1x2xf32> to vector<1x4x2xf32>
    %130 = arith.mulf %129, %128 : vector<1x4x2xf32>
    %cst_75 = arith.constant dense<0.000000e+00> : vector<1x4xf32>
    %131 = vector.multi_reduction <add>, %130, %cst_75 [2] : vector<1x4x2xf32> to vector<1x4xf32>
    %c0_76 = arith.constant 0 : index
    %c0_77 = arith.constant 0 : index
    %132 = vector.load %arg9[%c0_76, %c0_77] : memref<1x4xf32, #tpu.memory_space<vmem>>, vector<1x4xf32>
    %133 = arith.addf %131, %132 : vector<1x4xf32>
    %cst_78 = arith.constant 0.166666672 : f32
    %134 = vector.broadcast %cst_78 : f32 to vector<1x4xf32>
    %135 = arith.mulf %133, %134 : vector<1x4xf32>
    %cst_79 = arith.constant 5.000000e-01 : f32
    %136 = vector.broadcast %cst_79 : f32 to vector<1x4xf32>
    %137 = arith.addf %135, %136 : vector<1x4xf32>
    %cst_80 = arith.constant 0.000000e+00 : f32
    %cst_81 = arith.constant 1.000000e+00 : f32
    %138 = vector.broadcast %cst_80 : f32 to vector<1x4xf32>
    %139 = arith.maximumf %138, %137 : vector<1x4xf32>
    %140 = vector.broadcast %cst_81 : f32 to vector<1x4xf32>
    %141 = arith.minimumf %140, %139 : vector<1x4xf32>
    %142 = arith.truncf %111 : vector<1x4x16x16xf32> to vector<1x4x16x16xbf16>
    %143 = vector.shape_cast %142 : vector<1x4x16x16xbf16> to vector<1x4x256xbf16>
    %c0_82 = arith.constant 0 : index
    %c0_83 = arith.constant 0 : index
    %144 = vector.load %arg10[%c0_82, %c0_83] : memref<8x4xf32, #tpu.memory_space<vmem>>, vector<8x4xf32>
    %145 = vector.shape_cast %144 : vector<8x4xf32> to vector<1x8x4xf32>
    %146 = vector.shape_cast %141 : vector<1x4xf32> to vector<1x1x4xf32>
    %147 = vector.broadcast %146 : vector<1x1x4xf32> to vector<1x8x4xf32>
    %148 = arith.mulf %145, %147 : vector<1x8x4xf32>
    %149 = arith.truncf %148 : vector<1x8x4xf32> to vector<1x8x4xbf16>
    "tpu.trace_start"() <{level = 10 : i32, message = "noc,ncs->nos"}> : () -> ()
    %cst_84 = arith.constant dense<0.000000e+00> : vector<1x8x256xf32>
    %150 = tpu.matmul %149, %143, %cst_84 {dimension_numbers = #tpu.dot_dimension_numbers<[2], [1], [1], [2], [0, 0, 0, 1, 1, 2], [0], [0]>} : vector<1x8x4xbf16>, vector<1x4x256xbf16>, vector<1x8x256xf32> -> vector<1x8x256xf32>
    "tpu.trace_stop"() : () -> ()
    %c0_85 = arith.constant 0 : index
    %c0_86 = arith.constant 0 : index
    %151 = vector.load %arg11[%c0_85, %c0_86] : memref<8x1xf32, #tpu.memory_space<vmem>>, vector<8x1xf32>
    %152 = vector.shape_cast %151 : vector<8x1xf32> to vector<1x8x1xf32>
    %153 = vector.broadcast %152 : vector<1x8x1xf32> to vector<1x8x256xf32>
    %154 = arith.addf %150, %153 : vector<1x8x256xf32>
    %cst_87 = arith.constant 0.000000e+00 : f32
    %155 = vector.broadcast %cst_87 : f32 to vector<1x8x256xf32>
    %156 = arith.maximumf %154, %155 : vector<1x8x256xf32>
    %c0_88 = arith.constant 0 : index
    %c0_89 = arith.constant 0 : index
    %c0_90 = arith.constant 0 : index
    %157 = vector.load %arg12[%c0_88, %c0_89, %c0_90] : memref<1x8x256xf32, #tpu.memory_space<vmem>>, vector<1x8x256xf32>
    tpu.vector_store %arg12[%c0_88, %c0_89, %c0_90], %156 {strides = array<i32>} : memref<1x8x256xf32, #tpu.memory_space<vmem>>, vector<1x8x256xf32>,
    return
  }
  func.func @transform_0(%arg0: i32) -> (i32, i32, i32, i32) {
    %c0_i32 = arith.constant 0 : i32
    %c0_i32_0 = arith.constant 0 : i32
    %c0_i32_1 = arith.constant 0 : i32
    %c0_i32_2 = arith.constant 0 : i32
    return %arg0, %c0_i32, %c0_i32_0, %c0_i32_1 : i32, i32, i32, i32
  }
  func.func @transform_1(%arg0: i32) -> (i32, i32) {
    %c0_i32 = arith.constant 0 : i32
    %c0_i32_0 = arith.constant 0 : i32
    %c0_i32_1 = arith.constant 0 : i32
    return %c0_i32, %c0_i32_0 : i32, i32
  }
  func.func @transform_2(%arg0: i32) -> (i32, i32, i32) {
    %c0_i32 = arith.constant 0 : i32
    %c0_i32_0 = arith.constant 0 : i32
    %c0_i32_1 = arith.constant 0 : i32
    %c0_i32_2 = arith.constant 0 : i32
    return %c0_i32, %c0_i32_0, %c0_i32_1 : i32, i32, i32
  }
  func.func @transform_3(%arg0: i32) -> (i32, i32, i32, i32, i32) {
    %c0_i32 = arith.constant 0 : i32
    %c0_i32_0 = arith.constant 0 : i32
    %c0_i32_1 = arith.constant 0 : i32
    %c0_i32_2 = arith.constant 0 : i32
    %c0_i32_3 = arith.constant 0 : i32
    %c0_i32_4 = arith.constant 0 : i32
    return %c0_i32, %c0_i32_0, %c0_i32_1, %c0_i32_2, %c0_i32_3 : i32, i32, i32, i32, i32
  }
  func.func @transform_4(%arg0: i32) -> (i32, i32, i32) {
    %c0_i32 = arith.constant 0 : i32
    %c0_i32_0 = arith.constant 0 : i32
    %c0_i32_1 = arith.constant 0 : i32
    %c0_i32_2 = arith.constant 0 : i32
    return %c0_i32, %c0_i32_0, %c0_i32_1 : i32, i32, i32
  }
  func.func @transform_5(%arg0: i32) -> (i32, i32) {
    %c0_i32 = arith.constant 0 : i32
    %c0_i32_0 = arith.constant 0 : i32
    %c0_i32_1 = arith.constant 0 : i32
    return %c0_i32, %c0_i32_0 : i32, i32
  }
  func.func @transform_6(%arg0: i32) -> (i32, i32) {
    %c0_i32 = arith.constant 0 : i32
    %c0_i32_0 = arith.constant 0 : i32
    %c0_i32_1 = arith.constant 0 : i32
    return %c0_i32, %c0_i32_0 : i32, i32
  }
  func.func @transform_7(%arg0: i32) -> (i32, i32) {
    %c0_i32 = arith.constant 0 : i32
    %c0_i32_0 = arith.constant 0 : i32
    %c0_i32_1 = arith.constant 0 : i32
    return %c0_i32, %c0_i32_0 : i32, i32
  }
  func.func @transform_8(%arg0: i32) -> (i32, i32) {
    %c0_i32 = arith.constant 0 : i32
    %c0_i32_0 = arith.constant 0 : i32
    %c0_i32_1 = arith.constant 0 : i32
    return %c0_i32, %c0_i32_0 : i32, i32
  }
  func.func @transform_9(%arg0: i32) -> (i32, i32) {
    %c0_i32 = arith.constant 0 : i32
    %c0_i32_0 = arith.constant 0 : i32
    %c0_i32_1 = arith.constant 0 : i32
    return %c0_i32, %c0_i32_0 : i32, i32
  }
  func.func @transform_10(%arg0: i32) -> (i32, i32) {
    %c0_i32 = arith.constant 0 : i32
    %c0_i32_0 = arith.constant 0 : i32
    %c0_i32_1 = arith.constant 0 : i32
    return %c0_i32, %c0_i32_0 : i32, i32
  }
  func.func @transform_11(%arg0: i32) -> (i32, i32, i32) {
    %c0_i32 = arith.constant 0 : i32
    %c0_i32_0 = arith.constant 0 : i32
    %c0_i32_1 = arith.constant 0 : i32
    return %arg0, %c0_i32, %c0_i32_0 : i32, i32, i32
  }
}

</mosaic_0001>

<bundles_post_ra>
// kernel: tpu_custom_call.1
= control target key start
LH: loop header
LB: loop body
LE: loop exit
PB: predicated region body
PF: predicated region fallthrough
CT: control target
= control target key end

     0   :  { %16 = vsyncpa [#allocation3], 0  ;;  %s3324_s0 = inlined_call_operand.vmem [shape: bf16[2,4,16,16], index: 0, kind: input, shape index: {}]   ;;  %s3325_s1 = inlined_call_operand.hbm [shape: bf16[16,48], index: 1, kind: input, shape index: {}]   ;;  %s3326_s2 = inlined_call_operand.hbm [shape: bf16[3,16,16], index: 2, kind: input, shape index: {}]   ;;  %s3327_s3 = inlined_call_operand.vmem [shape: f32[3,3,4,1,1], index: 3, kind: input, shape index: {}]   ;;  %s3328_s4 = inlined_call_operand.vmem [shape: f32[4,1,1], index: 4, kind: input, shape index: {}]   ;;  %s3329_s5 = inlined_call_operand.vmem [shape: f32[2,4], index: 5, kind: input, shape index: {}]   ;;  %s3330_s6 = inlined_call_operand.vmem [shape: f32[1,2], index: 6, kind: input, shape index: {}]   ;;  %s3331_s7 = inlined_call_operand.vmem [shape: f32[4,2], index: 7, kind: input, shape index: {}]   ;;  %s3332_s8 = inlined_call_operand.vmem [shape: f32[1,4], index: 8, kind: input, shape index: {}]   ;;  %s3333_s9 = inlined_call_operand.vmem [shape: f32[8,4], index: 9, kind: input, shape index: {}]   ;;  %s3334_s10 = inlined_call_operand.vmem [shape: f32[8,1], index: 10, kind: input, shape index: {}]   ;;  %s3335_s11 = inlined_call_operand.hbm [shape: f32[2,8,256], index: 11, kind: output, shape index: {}]  }
   0x1   :  { %17 = vsyncpa [#allocation6], 0 }
   0x2   :  { %18 = vsyncpa [#allocation4], 0 }
   0x3   :  { %20 = vsyncpa [#allocation4 + $0x1], 0  ;;  %s2635_s17 = smov 0   ;;  %s2637_s18 = smov 0  }
   0x4   :  { %s2639_s19 = smov 0   ;;  %s2641_s20 = smov 0  }
   0x5 LB: > { %3354 = sst [smem:[#allocation11_spill]] %s2546_s17  ;;  %s2656_s21 = sadd.s32 4294967295, %s2558_s20   ;;  %s2558_s20 = sphi %s2641_s20, %s3389_s20   ;;  %s2554_s19 = sphi %s2639_s19, %s3391_s19   ;;  %s2550_s18 = sphi %s2637_s18, %s3393_s18   ;;  %s2546_s17 = sphi %s2635_s17, %s3392_s17  }
   0x6   : > { %3355 = sst [smem:[#allocation12_spill]] %s2554_s19  ;;  %s2156_s22 = sadd.s32 4294967294, %s2558_s20  }
   0x7   : > { %s2660_s23 = sadd.s32 1, %s2558_s20   ;;  %s269_s24 = sadd.s32 1, %s2554_s19 }
   0x8   : > { %3356 = sst [smem:[#allocation13_spill]] %s2660_s23  ;;  %s266_s25 = ssub.s32 %s2558_s20, %s2660_s23 }
   0x9   : > { %p279_p0 = scmp.ne.s32.totalorder %s2554_s19, %s2550_s18  ;;  %p267_p1 = scmp.eq.s32.totalorder %s266_s25, 0 }
   0xa   : > { %p280_p2 = scmp.eq.s32.totalorder %s2656_s21, 1  ;;  %p285_p3 = scmp.ne.s32.totalorder %s2550_s18, %s2546_s17 }
   0xb   : > { %p286_p4 = scmp.eq.s32.totalorder %s2156_s22, 1  ;;  %p2157_p7 = scmp.ge.s32.totalorder %s2558_s20, 1 }
   0xc   : > { %s2671_s26 = scalar_select %p267_p1, %s2554_s19, %s269_s24  }
   0xd   : > { %p2673_p5 = por %p280_p2, %p279_p0  ;;  %p2677_p6 = por %p286_p4, %p285_p3 }
   0xe   : > { %3357 = sst [smem:[#allocation14_spill]] %s2671_s26  ;;  %p293_p8 = scmp.lt.s32.totalorder %s2558_s20, 3 }
   0xf   : > { %s3358_s27 = scalar_select %p2673_p5, 1, 0 }
  0x10   : > { %s3359_s28 = scalar_select %p2677_p6, 1, 0 }
  0x11   : > { %p3337_p9 = scmp.eq.s32.totalorder %s2656_s21, 0  ;;  %p2684_p10 = pnand %p2157_p7, %p293_p8 }
  0x12   : > { %3360 = sst [smem:[#allocation15_spill]] %s3359_s28  ;;  %s2560_s30 = smov [#allocation2]  }
  0x13   : > { %s3361_s29 = scalar_select %p2684_p10, 1, 0 }
  0x14   : > { %s305_s12 = sshll.u32 %s2560_s30, 4  ;;  %p2360_p11 = pneg %p2684_p10  ;;  %s306_s12 = int_to_ptr.vmem [resolvable:$true] %s305_s12 }
  0x15   : > { %s2561_s14 = smov [#allocation5]   ;;  %s2432_s24 = scalar_lea.hbm %s3325_s1, 128 }
  0x16   : > { %p2692_p12 = pnand %p3337_p9, %p2360_p11  ;;  %s318_s15 = sshll.u32 %s2561_s14, 4  ;;  %s2696_s15 = int_to_ptr.vmem [resolvable:$true] %s318_s15 }
  0x17   : > { %p2433_p13 = scmp.ne.s32.totalorder %s3325_s1, %s2432_s24  ;;  %p2439_p3 = scmp.lt.u32.totalorder %s2432_s24, %s3325_s1 }
  0x18   : > { %p2434_p0 = pneg %p2692_p12 }
  0x1a   : > { %p2435_p1 = pnand %p2434_p0, %p2433_p13 }
  0x1c   : > { %p2436_p2 = pneg %p2435_p1 }
  0x1e   : > { %p2441_p4 = pnand %p2439_p3, %p2436_p2 }
  0x20   : > { %2444 = shalt.err (!%p2441_p4)
}
  0x21   : > { %s2445_s14 = scalar_lea.vmem %s306_s12, 128  ;;  %p2453_p9 = scmp.lt.s32.totalorder %s306_s12, %s306_s12 }
  0x22   : > { %p2446_p7 = scmp.ne.s32.totalorder %s306_s12, %s2445_s14  ;;  %p2454_p6 = scmp.lt.s32.totalorder %s2445_s14, %s2445_s14 }
  0x24   : > { %p2448_p8 = pnand %p2446_p7, %p2434_p0  ;;  %p2455_p5 = por %p2454_p6, %p2453_p9 }
  0x26   : > { %p2449_p11 = pneg %p2448_p8 }
  0x28   : > { %p2456_p10 = pnand %p2455_p5, %p2449_p11 }
  0x2a   : > { %2459 = shalt.err (!%p2456_p10)
}
  0x2b   : > { %s2562_s16 = smov 64   ;;  %s2563_s22 = smov 4  }
  0x2c   : > { %2363 = dma.hbm_to_vmem [thread:$0]  (!%p2692_p12), %s3325_s1, 128, %s306_s12, [#allocation3], %s2562_s16, %s2562_s16, %s2563_s22  }
  0x2d   : > { %s2460_s30 = scalar_lea.hbm %s3326_s2, 384 }
  0x2e   : > { %p2461_p13 = scmp.ne.s32.totalorder %s3326_s2, %s2460_s30  ;;  %p2467_p9 = scmp.lt.u32.totalorder %s2460_s30, %s3326_s2 }
  0x30   : > { %p2463_p5 = pnand %p2461_p13, %p2434_p0 }
  0x32   : > { %p2464_p6 = pneg %p2463_p5 }
  0x34   : > { %p2469_p10 = pnand %p2467_p9, %p2464_p6 }
  0x36   : > { %2472 = shalt.err (!%p2469_p10)
}
  0x37   : > { %s2473_s12 = scalar_lea.vmem %s2696_s15, 384  ;;  %p2481_p4 = scmp.lt.s32.totalorder %s2696_s15, %s2696_s15 }
  0x38   : > { %p2474_p1 = scmp.ne.s32.totalorder %s2696_s15, %s2473_s12  ;;  %p2482_p7 = scmp.lt.s32.totalorder %s2473_s12, %s2473_s12 }
  0x3a   : > { %p2476_p2 = pnand %p2474_p1, %p2434_p0  ;;  %p2483_p8 = por %p2482_p7, %p2481_p4 }
  0x3c   : > { %p2477_p3 = pneg %p2476_p2 }
  0x3e   : > { %p2484_p11 = pnand %p2483_p8, %p2477_p3 }
  0x40   : > { %2487 = shalt.err (!%p2484_p11)
}
  0x41   : > { %2366 = dma.hbm_to_vmem [thread:$0]  (!%p2692_p12), %s3326_s2, 384, %s2696_s15, [#allocation6], %s2562_s16, %s2562_s16, %s2563_s22  }
  0x42   : > { %p3363_p13 = scmp.ne.s32.totalorder %s3361_s29, 0 }
  0x44   : > { %366 = sbr.rel (%p3363_p13) target bundleno = 2039 (0x7f7), region = 64 }
  0x4b   : > { %p3364_p5 = scmp.eq.s32.totalorder %s2656_s21, 0 }
  0x4d   : > { %2533 = dma.done.wait (%p3364_p5), [#allocation3], 128   ;;  %p3365_p0 = pmov %p3364_p5 }
  0x4f   : > { %2535 = vsyncadd (%p3365_p0), [#allocation3], 4294967168  ;;  %p3366_p6 = pmov %p3365_p0 }
  0x50   : > { %p3367_p9 = pmov %p3365_p0 }
  0x51   : > { %2537 = dma.done.wait (%p3366_p6), [#allocation6], 384  }
  0x52   : > { %2539 = vsyncadd (%p3367_p9), [#allocation6], 4294966912  ;;  %p410_p10 = scmp.lt.s32.totalorder %s2656_s21, 1  ;;  %v2428_v4 = vld [vmem:[#allocation2] sm:$0xff]   ;;  %v2184_v5 = vld [vmem:[%s3327_s3 + $0xc] ss:$0 sm:$0xff] }
  0x53   : > { %2294 = vmatprep.subr.bf16.mxu0 %v2428_v4  ;;  %v3344_v6 = vmov 0   ;;  %v2176_v7 = vld [vmem:[%s3327_s3] ss:$0 sm:$0xff]  ;;  %v2177_v8 = vld [vmem:[%s3327_s3 + $0x1] ss:$0 sm:$0xff]  ;;  %vm520_vm0 = vcmask 130048  }
  0x54   : > { %s411_s28 = scalar_select %p410_p10, %s2656_s21, 1  ;;  %2295 = vmatpush3.bf16.msra.mxu0 %v2428_v4  ;;  %v2185_v9 = vld [vmem:[%s3327_s3 + $0xd] ss:$0 sm:$0xff]  ;;  %v2192_v10 = vld [vmem:[%s3327_s3 + $0x18] ss:$0 sm:$0xff]  ;;  %v2429_v47 = vld [vmem:[#allocation5 + $0x8] sm:$0xff]  }
  0x55   : > { %v2178_v11 = vld [vmem:[%s3327_s3 + $0x2] ss:$0 sm:$0xff]  ;;  %v2193_v12 = vld [vmem:[%s3327_s3 + $0x19] ss:$0 sm:$0xff]  ;;  %v2179_v13 = vld [vmem:[%s3327_s3 + $0x3] ss:$0 sm:$0xff]  ;;  %2304 = vmatprep.subr.bf16.mxu0 %v2429_v47 }
  0x56   : > { %s2272_s13 = sshll.u32 %s411_s28, 5  ;;  %v2186_v14 = vld [vmem:[%s3327_s3 + $0xe] ss:$0 sm:$0xff]  ;;  %v2194_v15 = vld [vmem:[%s3327_s3 + $0x1a] ss:$0 sm:$0xff]  ;;  %vm1554_vm1 = vcmask 130112  }
  0x57   : > { %s414_s16 = scalar_lea.vmem %s3324_s0, %s2272_s13  ;;  %v2187_v16 = vld [vmem:[%s3327_s3 + $0xf] ss:$0 sm:$0xff]  ;;  %v2200_v17 = vld [vmem:[%s3327_s3 + $0x4] ss:$0 sm:$0xff]  ;;  %v2195_v18 = vld [vmem:[%s3327_s3 + $0x1b] ss:$0 sm:$0xff] }
  0x58   : > { %v2424_v0 = vld [vmem:[%s414_s16] sm:$0xff]   ;;  %v2425_v1 = vld [vmem:[%s414_s16 + $0x8] sm:$0xff]   ;;  %v2426_v2 = vld [vmem:[%s414_s16 + $0x10] sm:$0xff]   ;;  %vm1583_vm2 = vcmask 1041409   ;;  %vm1585_vm3 = vcmask 1042434   ;;  %vm1587_vm4 = vcmask 1043459  }
  0x59   : > { %448 = vxpose.xlu0.c.b16.start.end [1/1] (short) (narrow) %v2424_v0, 16  ;;  %v2427_v3 = vld [vmem:[%s414_s16 + $0x18] sm:$0xff]   ;;  %480 = vxpose.xlu1.c.b16.start.end [1/1] (short) (narrow) %v2426_v2, 16  ;;  %v2234_v19 = vld [vmem:[%s3327_s3 + $0x8] ss:$0 sm:$0xff]  ;;  %vm1590_vm5 = vcmask 125952  }
  0x5a   : > { %v2208_v20 = vld [vmem:[%s3327_s3 + $0x10] ss:$0 sm:$0xff]  ;;  %v2201_v21 = vld [vmem:[%s3327_s3 + $0x5] ss:$0 sm:$0xff]  ;;  %v2242_v22 = vld [vmem:[%s3327_s3 + $0x14] ss:$0 sm:$0xff] }
  0x5b   : > { %v2235_v23 = vld [vmem:[%s3327_s3 + $0x9] ss:$0 sm:$0xff]  ;;  %v2209_v24 = vld [vmem:[%s3327_s3 + $0x11] ss:$0 sm:$0xff]  ;;  %v2216_v25 = vld [vmem:[%s3327_s3 + $0x1c] ss:$0 sm:$0xff] }
  0x5c   : > { %v2243_v26 = vld [vmem:[%s3327_s3 + $0x15] ss:$0 sm:$0xff]  ;;  %v2217_v27 = vld [vmem:[%s3327_s3 + $0x1d] ss:$0 sm:$0xff]  ;;  %v2250_v28 = vld [vmem:[%s3327_s3 + $0x20] ss:$0 sm:$0xff] }
  0x5d   : > { %464 = vxpose.xlu0.c.b16.start.end [1/1] (short) (narrow) %v2425_v1, 16  ;;  %496 = vxpose.xlu1.c.b16.start.end [1/1] (short) (narrow) %v2427_v3, 16  ;;  %v2202_v29 = vld [vmem:[%s3327_s3 + $0x6] ss:$0 sm:$0xff]  ;;  %v2251_v30 = vld [vmem:[%s3327_s3 + $0x21] ss:$0 sm:$0xff] }
  0x5e   : > { %v2236_v31 = vld [vmem:[%s3327_s3 + $0xa] ss:$0 sm:$0xff]  ;;  %v2210_v32 = vld [vmem:[%s3327_s3 + $0x12] ss:$0 sm:$0xff]  ;;  %v2203_v33 = vld [vmem:[%s3327_s3 + $0x7] ss:$0 sm:$0xff] }
  0x5f   : > { %v2244_v34 = vld [vmem:[%s3327_s3 + $0x16] ss:$0 sm:$0xff]  ;;  %v2237_v35 = vld [vmem:[%s3327_s3 + $0xb] ss:$0 sm:$0xff]  ;;  %v2211_v36 = vld [vmem:[%s3327_s3 + $0x13] ss:$0 sm:$0xff] }
  0x60   : > { %v2218_v37 = vld [vmem:[%s3327_s3 + $0x1e] ss:$0 sm:$0xff]  ;;  %v2245_v38 = vld [vmem:[%s3327_s3 + $0x17] ss:$0 sm:$0xff]  ;;  %v2219_v39 = vld [vmem:[%s3327_s3 + $0x1f] ss:$0 sm:$0xff] }
  0x61   : > { %2423 = vset.pattern.permute.xlu1 %v3344_v6  ;;  %v2252_v40 = vld [vmem:[%s3327_s3 + $0x22] ss:$0 sm:$0xff]  ;;  %v2253_v41 = vld [vmem:[%s3327_s3 + $0x23] ss:$0 sm:$0xff]  ;;  %v2430_v48 = vld [vmem:[#allocation5] sm:$0xff]   ;;  %vm1633_vm6 = vcmask 25600  }
  0x62   : > { %756 = vperm.xlu1 %2423, %v2184_v5   ;;  %2314 = vmatprep.subr.bf16.mxu1 %v2430_v48  ;;  %v2260_v4 = vld [vmem:[%s3328_s4 + $0x1] ss:$0 sm:$0xff]  ;;  %s2567_s29 = smov 16   ;;  %s2568_s16 = smov 32   ;;  %vm1723_vm7 = vcmask 11264   ;;  %vm1945_vm8 = vcmask 261120  }
  0x63   : > { %2315 = vmatpush3.bf16.msra.mxu1 %v2430_v48  ;;  %s2569_s22 = smov 48   ;;  %s2570_s19 = smov 64   ;;  %vm1948_vm9 = vcmask 392192   ;;  %vm1951_vm10 = vcmask 523264   ;;  %vm1954_vm11 = vcmask 654336   ;;  %vm1957_vm12 = vcmask 785408  }
  0x64   : > { %s2571_s26 = smov 80   ;;  %s2572_s24 = smov 96   ;;  %vm1960_vm13 = vcmask 916480   ;;  %vm2010_vm14 = vcmask 1041408   ;;  %vm2006_vm15 = vcmask 31744  }
  0x65   : > { %s2573_s25 = smov 112   ;;  %s407_s23 = sand.u32 1, %s2550_s18  }
  0x66   : > { %2422 = vset.pattern.permute.xlu0 %v3344_v6  ;;  %703 = vperm.xlu1 %2423, %v2177_v8   ;;  %v2897_v8 = vld [vmem:[#allocation5 + $0x10] sm:$0xff]   ;;  %s2164_s28 = sshll.u32 %s407_s23, 4  ;;  %s2273_s13 = sshll.u32 %s2656_s21, 8 }
  0x67   : > { %699 = vperm.xlu0 %2422, %v2176_v7   ;;  %2324 = vmatprep.subr.bf16.mxu1 %v2897_v8  ;;  %s409_s15 = scalar_lea.vmem [#allocation7], %s2164_s28  ;;  %s2061_s21 = scalar_lea.sflag [#allocation4], %s407_s23 }
  0x68   : > { %p3385_p1 = scmp.ne.s32.totalorder %s3358_s27, 0 }
  0x6a   : > { %760 = vperm.xlu1 %2423, %v2185_v9   ;;  %v2262_v9 = vld [vmem:[%s3328_s4 + $0x3] ss:$0 sm:$0xff] }
  0x6b   : > { %821 = vperm.xlu0 %2422, %v2192_v10   ;;  %v2259_v10 = vld [vmem:[%s3328_s4] ss:$0 sm:$0xff] }
  0x6e   : > { %825 = vperm.xlu1 %2423, %v2193_v12  }
  0x6f   : > { %707 = vperm.xlu0 %2422, %v2178_v11  }
  0x72   : > { %764 = vperm.xlu1 %2423, %v2186_v14  }
  0x73   : > { %711 = vperm.xlu0 %2422, %v2179_v13   ;;  %v2261_v13 = vld [vmem:[%s3328_s4 + $0x2] ss:$0 sm:$0xff] }
  0x76   : > { %768 = vperm.xlu1 %2423, %v2187_v16  }
  0x77   : > { %829 = vperm.xlu0 %2422, %v2194_v15  }
  0x7a   : > { %833 = vperm.xlu1 %2423, %v2195_v18  }
  0x7b   : > { %884 = vperm.xlu0 %2422, %v2200_v17  }
  0x7e   : > { %933 = vperm.xlu1 %2423, %v2208_v20  }
  0x7f   : > { %1220 = vperm.xlu0 %2422, %v2234_v19  }
  0x82   : > { %1269 = vperm.xlu1 %2423, %v2242_v22  }
  0x83   : > { %888 = vperm.xlu0 %2422, %v2201_v21  }
  0x86   : > { %937 = vperm.xlu1 %2423, %v2209_v24  }
  0x87   : > { %1224 = vperm.xlu0 %2422, %v2235_v23  }
  0x8a   : > { %1273 = vperm.xlu1 %2423, %v2243_v26  }
  0x8b   : > { %990 = vperm.xlu0 %2422, %v2216_v25  }
  0x8e   : > { %1326 = vperm.xlu1 %2423, %v2250_v28  }
  0x8f   : > { %994 = vperm.xlu0 %2422, %v2217_v27  }
  0x92   : > { %1330 = vperm.xlu1 %2423, %v2251_v30  }
  0x93   : > { %892 = vperm.xlu0 %2422, %v2202_v29  }
  0x96   : > { %941 = vperm.xlu1 %2423, %v2210_v32  }
  0x97   : > { %1228 = vperm.xlu0 %2422, %v2236_v31  }
  0x9a   : > { %1277 = vperm.xlu1 %2423, %v2244_v34  }
  0x9b   : > { %896 = vperm.xlu0 %2422, %v2203_v33  }
  0x9e   : > { %945 = vperm.xlu1 %2423, %v2211_v36  }
  0x9f   : > { %1232 = vperm.xlu0 %2422, %v2237_v35  }
  0xa2   : > { %1281 = vperm.xlu1 %2423, %v2245_v38  }
  0xa3   : > { %998 = vperm.xlu0 %2422, %v2218_v37  }
  0xa6   : > { %1334 = vperm.xlu1 %2423, %v2252_v40  }
  0xa7   : > { %1002 = vperm.xlu0 %2422, %v2219_v39  }
  0xaa   : > { %1338 = vperm.xlu1 %2423, %v2253_v41  }
  0xbf   : > { %v456_v42 = vpop.trf.xlu0  ;;  %v488_v44 = vpop.trf.xlu1 }
  0xc0   : > { %2296 = vmatprep.mubr.msk.bf16.mxu0 %vm520_vm0, %v456_v42 }
  0xc3   : > { %v472_v43 = vpop.trf.xlu0  ;;  %v504_v45 = vpop.trf.xlu1 }
  0xc4   : > { %2297 = vmatmul.mubr.msk.bf16.vlgmr.msra.gmra.mrb[0].mxu0 %vm520_vm0, %v472_v43 }
  0xc5   : > { %2300 = vmatprep.mubr.msk.bf16.mxu0 %vm520_vm0, %v488_v44  ;;  %2305 = vmatpush3.bf16.msra.mxu0 %v2429_v47 }
  0xcc   : > { %2301 = vmatmul.mubr.msk.bf16.gmra.mrb[4].mxu0 %vm520_vm0, %v504_v45 }
  0xe1   : > { %v2874_v46 = vpop.permute.xlu1 %756 }
  0xe5   : > { %v2876_v50 = vpop.permute.xlu1 %703 }
  0xe6   : > { %v2880_v57 = vpop.permute.xlu0 %699 }
  0xe9   : > { %v2878_v56 = vpop.permute.xlu1 %760 }
  0xea   : > { %v2884_v1 = vpop.permute.xlu0 %821 }
  0xed   : > { %v2882_v0 = vpop.permute.xlu1 %825 }
  0xee   : > { %v2888_v3 = vpop.permute.xlu0 %707 }
  0xf1   : > { %v2886_v2 = vpop.permute.xlu1 %764 }
  0xf2   : > { %v2895_v7 = vpop.permute.xlu0 %711 }
  0xf5   : > { %v2893_v5 = vpop.permute.xlu1 %768 }
  0xf6   : > { %v2908_v12 = vpop.permute.xlu0 %829 }
  0xf9   : > { %v2906_v11 = vpop.permute.xlu1 %833 }
  0xfa   : > { %v885_v15 = vpop.permute.xlu0 %884 }
  0xfd   : > { %v934_v14 = vpop.permute.xlu1 %933 }
  0xfe   : > { %v1221_v17 = vpop.permute.xlu0 %1220 }
 0x101   : > { %v2913_v16 = vpop.permute.xlu1 %1269 }
 0x102   : > { %v889_v19 = vpop.permute.xlu0 %888 }
 0x105   : > { %v938_v18 = vpop.permute.xlu1 %937 }
 0x106   : > { %v2917_v21 = vpop.permute.xlu0 %1224 }
 0x109   : > { %v2915_v20 = vpop.permute.xlu1 %1273 }
 0x10a   : > { %v991_v23 = vpop.permute.xlu0 %990 }
 0x10d   : > { %v2919_v22 = vpop.permute.xlu1 %1326 }
 0x10e   : > { %v995_v25 = vpop.permute.xlu0 %994 }
 0x111   : > { %v2921_v24 = vpop.permute.xlu1 %1330 }
 0x112   : > { %3368 = vst [vmem:[#allocation16_spill] sm:$0xff] %v2921_v24  ;;  %v2925_v27 = vpop.permute.xlu0 %892 }
 0x115   : > { %v2923_v26 = vpop.permute.xlu1 %941 }
 0x116   : > { %v2929_v29 = vpop.permute.xlu0 %1228 }
 0x117   : > { %3370 = vst [vmem:[#allocation18_spill] sm:$0xff] %v2929_v29 }
 0x119   : > { %v2927_v28 = vpop.permute.xlu1 %1277 }
 0x11a   : > { %3369 = vst [vmem:[#allocation17_spill] sm:$0xff] %v2927_v28  ;;  %v2933_v31 = vpop.permute.xlu0 %896 }
 0x11d   : > { %v2931_v30 = vpop.permute.xlu1 %945 }
 0x11e   : > { %v2937_v33 = vpop.permute.xlu0 %1232 }
 0x11f   : > { %3372 = vst [vmem:[#allocation20_spill] sm:$0xff] %v2937_v33 }
 0x121   : > { %v2935_v32 = vpop.permute.xlu1 %1281 }
 0x122   : > { %3371 = vst [vmem:[#allocation19_spill] sm:$0xff] %v2935_v32  ;;  %v2941_v35 = vpop.permute.xlu0 %998 }
 0x125   : > { %v2939_v34 = vpop.permute.xlu1 %1334 }
 0x126   : > { %3373 = vst [vmem:[#allocation21_spill] sm:$0xff] %v2939_v34  ;;  %v2945_v37 = vpop.permute.xlu0 %1002 }
 0x129   : > { %v2943_v36 = vpop.permute.xlu1 %1338 }
 0x12a   : > { %3374 = vst [vmem:[#allocation22_spill] sm:$0xff] %v2943_v36 }
 0x197   : > { %v2298_v49 = vpop.f32.mrb[0].mxu0 }
 0x198   : > { %v567_v51 = vpop.f32.mrb[1].mxu0 }
 0x199   : > { %v2299_v52 = vpop.f32.mrb[2].mxu0 }
 0x19a   : > { %v599_v53 = vpack.c.bf16 %v2299_v52, %v2298_v49  ;;  %v570_v54 = vpop.f32.mrb[3].mxu0 }
 0x19b   : > { %v598_v55 = vpack.c.bf16 %v570_v54, %v567_v51 }
 0x19c   : > { %618 = vxpose.xlu1.c.b16.start.end [1/1] (short) (narrow) %v599_v53, 48 }
 0x19d   : > { %602 = vxpose.xlu0.c.b16.start.end [1/1] (short) (narrow) %v598_v55, 48 }
 0x19f   : > { %v2302_v58 = vpop.f32.mrb[4].mxu0 }
 0x1a0   : > { %v583_v59 = vpop.f32.mrb[5].mxu0 }
 0x1a1   : > { %v2303_v60 = vpop.f32.mrb[6].mxu0 }
 0x1a2   : > { %v601_v61 = vpack.c.bf16 %v2303_v60, %v2302_v58  ;;  %v586_v62 = vpop.f32.mrb[7].mxu0 }
 0x1a3   : > { %v600_v63 = vpack.c.bf16 %v586_v62, %v583_v59 }
 0x1a5   : > { %650 = vxpose.xlu1.c.b16.start.end [1/1] (short) (narrow) %v601_v61, 48 }
 0x1a6   : > { %634 = vxpose.xlu0.c.b16.start.end [1/1] (short) (narrow) %v600_v63, 48 }
 0x1b1   : > { %1484 = vperm.xlu1 %2423, %v2260_v4  }
 0x1b5   : > { %1492 = vperm.xlu1 %2423, %v2262_v9  }
 0x1b7   : > { %1480 = vperm.xlu0 %2422, %v2259_v10  }
 0x1bb   : > { %1488 = vperm.xlu0 %2422, %v2261_v13  }
 0x202   : > { %v626_v38 = vpop.trf.xlu1 }
 0x203   : > { %v610_v39 = vpop.trf.xlu0  ;;  %v2947_v43 = vunpack.c.l.bf16 %v626_v38  ;;  %v2949_v44 = vunpack.c.h.bf16 %v626_v38 }
 0x204   : > { %v670_v49 = vunpack.c.l.bf16 %v610_v39  ;;  %v671_v51 = vunpack.c.h.bf16 %v610_v39 }
 0x205   : > { %3375 = vst [vmem:[#allocation23_spill] sm:$0xff] %v2949_v44  ;;  %v716_v58 = vmul.f32 %v2876_v50, %v2947_v43  ;;  %v717_v59 = vmul.f32 %v2876_v50, %v2949_v44  ;;  %v901_v62 = vmul.f32 %v889_v19, %v2947_v43  ;;  %v902_v63 = vmul.f32 %v889_v19, %v2949_v44 }
 0x206   : > { %v627_v40 = vpop.trf.xlu1  ;;  %v714_v13 = vmul.f32 %v2880_v57, %v670_v49  ;;  %v2967_v38 = vmul.f32 %v2880_v57, %v671_v51  ;;  %v899_v50 = vmul.f32 %v885_v15, %v670_v49  ;;  %v1235_v6 = vmul.f32 %v1221_v17, %v670_v49 }
 0x207   : > { %v611_v41 = vpop.trf.xlu0  ;;  %v729_v52 = vunpack.c.l.bf16 %v627_v40  ;;  %v2951_v53 = vunpack.c.h.bf16 %v627_v40  ;;  %v1236_v36 = vmul.f32 %v1221_v17, %v671_v51 }
 0x208   : > { %v727_v47 = vunpack.c.l.bf16 %v611_v41  ;;  %v728_v48 = vunpack.c.h.bf16 %v611_v41  ;;  %v900_v41 = vmul.f32 %v885_v15, %v671_v51 }
 0x209   : > { %v950_v39 = vmul.f32 %v938_v18, %v729_v52  ;;  %v951_v40 = vmul.f32 %v938_v18, %v2951_v53  ;;  %v773_v32 = vmul.f32 %v2878_v56, %v729_v52  ;;  %v774_v57 = vmul.f32 %v2878_v56, %v2951_v53 }
 0x20a   : > { %v628_v42 = vpop.trf.xlu1  ;;  %v948_v4 = vmul.f32 %v934_v14, %v727_v47  ;;  %v949_v9 = vmul.f32 %v934_v14, %v728_v48  ;;  %v1284_v15 = vmul.f32 %v2913_v16, %v727_v47  ;;  %v2983_v44 = vmul.f32 %v2915_v20, %v729_v52 }
 0x20b   : > { %v612_v45 = vpop.trf.xlu0  ;;  %v2959_v60 = vunpack.c.l.bf16 %v628_v42  ;;  %v2961_v61 = vunpack.c.h.bf16 %v628_v42  ;;  %v958_v18 = vadd.f32 %v950_v39, %v901_v62  ;;  %v959_v28 = vadd.f32 %v951_v40, %v902_v63 }
 0x20c   : > { %v792_v54 = vunpack.c.l.bf16 %v612_v45  ;;  %v2953_v55 = vunpack.c.h.bf16 %v612_v45  ;;  %v956_v34 = vadd.f32 %v948_v4, %v899_v50  ;;  %v957_v29 = vadd.f32 %v949_v9, %v900_v41 }
 0x20d   : > { %v1007_v19 = vmul.f32 %v995_v25, %v2959_v60  ;;  %v1008_v14 = vmul.f32 %v995_v25, %v2961_v61  ;;  %v838_v17 = vmul.f32 %v2882_v0, %v2959_v60  ;;  %v839_v25 = vmul.f32 %v2882_v0, %v2961_v61 }
 0x20e   : > { %v658_v10 = vpop.trf.xlu1  ;;  %v1005_v45 = vmul.f32 %v991_v23, %v792_v54  ;;  %v1006_v42 = vmul.f32 %v991_v23, %v2953_v55  ;;  %v1285_v23 = vmul.f32 %v2913_v16, %v728_v48  ;;  %v771_v56 = vmul.f32 %v2874_v46, %v727_v47 }
 0x20f   : > { %v642_v33 = vpop.trf.xlu0  ;;  %v1015_v62 = vadd.f32 %v1007_v19, %v958_v18  ;;  %v1016_v63 = vadd.f32 %v1008_v14, %v959_v28  ;;  %v781_v4 = vadd.f32 %v773_v32, %v716_v58  ;;  %v782_v9 = vadd.f32 %v774_v57, %v717_v59 }
 0x210   : > { %v1013_v49 = vadd.f32 %v1005_v45, %v956_v34  ;;  %v1014_v51 = vadd.f32 %v1006_v42, %v957_v29  ;;  %v772_v16 = vmul.f32 %v2874_v46, %v728_v48  ;;  %v2987_v39 = vunpack.c.l.bf16 %v658_v10 }
 0x211   : > { %v2989_v40 = vadd.f32 %v1284_v15, %v1235_v6  ;;  %v2991_v50 = vadd.f32 %v1285_v23, %v1236_v36  ;;  %v2993_v0 = vunpack.c.h.bf16 %v658_v10  ;;  %v846_v52 = vadd.f32 %v838_v17, %v781_v4 }
 0x212   : > { %v659_v24 = vpop.trf.xlu1  ;;  %v847_v41 = vadd.f32 %v839_v25, %v782_v9  ;;  %v2997_v47 = vunpack.c.l.bf16 %v642_v33  ;;  %v1021_v28 = vpack.c.bf16 %v1014_v51, %v1013_v49  ;;  %v1022_v32 = vpack.c.bf16 %v1016_v63, %v1015_v62 }
 0x213   : > { %v2995_v29 = vunpack.c.l.bf16 %v659_v24  ;;  %v643_v34 = vpop.trf.xlu0  ;;  %v3000_v58 = vmul.f32 %v2919_v22, %v792_v54  ;;  %v3002_v46 = vunpack.c.h.bf16 %v642_v33  ;;  %v3004_v6 = vunpack.c.h.bf16 %v659_v24 }
 0x214   : > { %v3008_v36 = vmul.f32 %v2919_v22, %v2953_v55  ;;  %v720_v48 = vmul.f32 %v2895_v7, %v2987_v39  ;;  %v3012_v59 = vunpack.c.l.bf16 %v643_v34  ;;  %2306 = vmatprep.mubr.msk.bf16.mxu0 %vm520_vm0, %v1021_v28  ;;  %v836_v10 = vmul.f32 %v2884_v1, %v792_v54 }
 0x215   : > { %v721_v45 = vmul.f32 %v2895_v7, %v2993_v0  ;;  %v905_v24 = vmul.f32 %v2933_v31, %v2987_v39  ;;  %v777_v33 = vmul.f32 %v2893_v5, %v2995_v29  ;;  %v3022_v22 = vunpack.c.h.bf16 %v643_v34  ;;  %2307 = vmatmul.mubr.msk.bf16.vlgmr.msra.gmra.mrb[8].mxu0 %vm520_vm0, %v1022_v32 }
 0x216   : > { %v660_v42 = vpop.trf.xlu1  ;;  %v906_v19 = vmul.f32 %v2933_v31, %v2993_v0  ;;  %v718_v54 = vmul.f32 %v2888_v3, %v2997_v47  ;;  %v954_v7 = vmul.f32 %v2931_v30, %v2995_v29  ;;  %v779_v14 = vadd.f32 %v771_v56, %v714_v13 }
 0x217   : > { %v719_v57 = vmul.f32 %v2888_v3, %v3002_v46  ;;  %v903_v18 = vmul.f32 %v2925_v27, %v2997_v47  ;;  %v955_v15 = vmul.f32 %v2931_v30, %v3004_v6  ;;  %v780_v23 = vadd.f32 %v772_v16, %v2967_v38  ;;  %v644_v13 = vpop.trf.xlu0 }
 0x218   : > { %v775_v31 = vmul.f32 %v2886_v2, %v3012_v59  ;;  %v837_v17 = vmul.f32 %v2884_v1, %v2953_v55  ;;  %v844_v25 = vadd.f32 %v836_v10, %v779_v14  ;;  %v3042_v49 = vunpack.c.l.bf16 %v660_v42 }
 0x219   : > { %v904_v3 = vmul.f32 %v2925_v27, %v3002_v46  ;;  %v778_v51 = vmul.f32 %v2893_v5, %v3004_v6  ;;  %v785_v56 = vadd.f32 %v777_v33, %v720_v48  ;;  %v776_v30 = vmul.f32 %v2886_v2, %v3022_v22 }
 0x21a   : > { %v962_v38 = vadd.f32 %v954_v7, %v905_v24  ;;  %v952_v62 = vmul.f32 %v2923_v26, %v3012_v59  ;;  %v845_v63 = vadd.f32 %v837_v17, %v780_v23  ;;  %v3052_v1 = vunpack.c.h.bf16 %v660_v42  ;;  %v3376_v17 = vld [vmem:[#allocation23_spill] sm:$0xff] }
 0x21b   : > { %v963_v55 = vadd.f32 %v955_v15, %v906_v19  ;;  %v953_v4 = vmul.f32 %v2923_v26, %v3022_v22  ;;  %v796_v9 = vunpack.c.l.bf16 %v644_v13  ;;  %v797_v27 = vunpack.c.h.bf16 %v644_v13 }
 0x21c   : > { %v783_v16 = vadd.f32 %v775_v31, %v718_v54  ;;  %v852_v34 = vpack.c.bf16 %v845_v63, %v844_v25  ;;  %v1011_v5 = vmul.f32 %v2945_v37, %v3042_v49  ;;  %v1012_v2 = vmul.f32 %v2945_v37, %v3052_v1 }
 0x21d   : > { %v853_v28 = vpack.c.bf16 %v847_v41, %v846_v52  ;;  %v842_v32 = vmul.f32 %v2906_v11, %v3042_v49  ;;  %v843_v48 = vmul.f32 %v2906_v11, %v3052_v1  ;;  %v840_v10 = vmul.f32 %v2908_v12, %v796_v9 }
 0x21e   : > { %v784_v26 = vadd.f32 %v776_v30, %v719_v57  ;;  %v960_v24 = vadd.f32 %v952_v62, %v903_v18  ;;  %2316 = vmatprep.mubr.msk.bf16.mxu1 %vm520_vm0, %v852_v34  ;;  %v841_v33 = vmul.f32 %v2908_v12, %v797_v27  ;;  %v1009_v42 = vmul.f32 %v2941_v35, %v796_v9  ;;  %v3383_v34 = vld [vmem:[#allocation20_spill] sm:$0xff] }
 0x21f   : > { %v786_v19 = vadd.f32 %v778_v51, %v721_v45  ;;  %v961_v54 = vadd.f32 %v953_v4, %v904_v3  ;;  %2317 = vmatmul.mubr.msk.bf16.vlgmr.msra.gmra.mrb[0].mxu1 %vm520_vm0, %v853_v28  ;;  %v848_v37 = vadd.f32 %v840_v10, %v783_v16  ;;  %v1010_v52 = vmul.f32 %v2941_v35, %v797_v27  ;;  %v3378_v3 = vld [vmem:[#allocation17_spill] sm:$0xff]  ;;  %v3384_v28 = vld [vmem:[#allocation22_spill] sm:$0xff] }
 0x220   : > { %v1019_v41 = vadd.f32 %v1011_v5, %v962_v38  ;;  %v1020_v7 = vadd.f32 %v1012_v2, %v963_v55  ;;  %v849_v11 = vadd.f32 %v841_v33, %v784_v26  ;;  %v1017_v14 = vadd.f32 %v1009_v42, %v960_v24  ;;  %2325 = vmatpush3.bf16.msra.mxu1 %v2897_v8  ;;  %v3377_v8 = vld [vmem:[#allocation16_spill] sm:$0xff] }
 0x221   : > { %v1287_v57 = vmul.f32 %v2915_v20, %v2951_v53  ;;  %v850_v18 = vadd.f32 %v842_v32, %v785_v56  ;;  %v851_v12 = vadd.f32 %v843_v48, %v786_v19  ;;  %v1018_v15 = vadd.f32 %v1010_v52, %v961_v54  ;;  %v3380_v56 = vld [vmem:[#allocation21_spill] sm:$0xff] }
 0x222   : > { %v1349_v45 = vadd.f32 %v3000_v58, %v2989_v40  ;;  %v1350_v23 = vadd.f32 %v3008_v36, %v2991_v50  ;;  %v854_v31 = vpack.c.bf16 %v849_v11, %v848_v37  ;;  %v1237_v35 = vmul.f32 %v2917_v21, %v2947_v43 }
 0x223   : > { %v1238_v25 = vmul.f32 %v2917_v21, %v3376_v17  ;;  %v1343_v13 = vmul.f32 %v3377_v8, %v2959_v60  ;;  %v1023_v20 = vpack.c.bf16 %v1018_v15, %v1017_v14  ;;  %v1344_v53 = vmul.f32 %v3377_v8, %v2961_v61  ;;  %v3379_v21 = vld [vmem:[#allocation18_spill] sm:$0xff] }
 0x224   : > { %v1288_v40 = vmul.f32 %v3378_v3, %v3012_v59  ;;  %v1289_v50 = vmul.f32 %v3378_v3, %v3022_v22  ;;  %2320 = vmatprep.mubr.msk.bf16.mxu1 %vm520_vm0, %v854_v31  ;;  %v1024_v58 = vpack.c.bf16 %v1020_v7, %v1019_v41  ;;  %v1294_v43 = vadd.f32 %v2983_v44, %v1237_v35 }
 0x225   : > { %v1295_v36 = vadd.f32 %v1287_v57, %v1238_v25  ;;  %v1239_v51 = vmul.f32 %v3379_v21, %v2997_v47  ;;  %2310 = vmatprep.mubr.msk.bf16.mxu0 %vm520_vm0, %v1023_v20  ;;  %v855_v60 = vpack.c.bf16 %v851_v12, %v850_v18  ;;  %v1240_v61 = vmul.f32 %v3379_v21, %v3002_v46  ;;  %v3382_v46 = vld [vmem:[#allocation19_spill] sm:$0xff] }
 0x226   : > { %v1345_v59 = vmul.f32 %v3380_v56, %v796_v9  ;;  %v1346_v30 = vmul.f32 %v3380_v56, %v797_v27  ;;  %2311 = vmatmul.mubr.msk.bf16.gmra.mrb[12].mxu0 %vm520_vm0, %v1024_v58  ;;  %v1357_v22 = vpack.c.bf16 %v1350_v23, %v1349_v45  ;;  %v3381_v44 = vmov 0  }
 0x227   : > { %2321 = vmatmul.mubr.msk.bf16.gmra.mrb[4].mxu1 %vm520_vm0, %v855_v60  ;;  %2047 = vmatprep.mubr.bf16.mxu0 %v3381_v44  ;;  %v1351_v38 = vadd.f32 %v1343_v13, %v1294_v43  ;;  %v1352_v62 = vadd.f32 %v1344_v53, %v1295_v36  ;;  %v1296_v47 = vadd.f32 %v1288_v40, %v1239_v51  ;;  %v1543_v58 = vlaneseq }
 0x228   : > { %v1297_v63 = vadd.f32 %v1289_v50, %v1240_v61  ;;  %2326 = vmatprep.mubr.msk.bf16.mxu1 %vm520_vm0, %v1357_v22  ;;  %v1290_v9 = vmul.f32 %v3382_v46, %v2995_v29  ;;  %v1291_v27 = vmul.f32 %v3382_v46, %v3004_v6  ;;  %v1241_v5 = vmul.f32 %v3383_v34, %v2987_v39 }
 0x229   : > { %v1353_v55 = vadd.f32 %v1345_v59, %v1296_v47  ;;  %v1358_v16 = vpack.c.bf16 %v1352_v62, %v1351_v38  ;;  %v1242_v2 = vmul.f32 %v3383_v34, %v2993_v0  ;;  %v1347_v32 = vmul.f32 %v3384_v28, %v3042_v49 }
 0x22a   : > { %v1354_v4 = vadd.f32 %v1346_v30, %v1297_v63  ;;  %v1348_v48 = vmul.f32 %v3384_v28, %v3052_v1  ;;  %v1298_v26 = vadd.f32 %v1290_v9, %v1241_v5  ;;  %v2565_v36 = vmov 1983009808  }
 0x22b   : > { %v1299_v24 = vadd.f32 %v1291_v27, %v1242_v2  ;;  %v1770_v21 = vunpack.c.l.s4 %v2565_v36 }
 0x22c   : > { %v1359_v10 = vpack.c.bf16 %v1354_v4, %v1353_v55  ;;  %v1355_v29 = vadd.f32 %v1347_v32, %v1298_v26 }
 0x22d   : > { %v1356_v6 = vadd.f32 %v1348_v48, %v1299_v24  ;;  %v1771_v34 = vunpack.c.0.s8 %v1770_v21  ;;  %v1763_v24 = vpack.i.b16 %v3381_v44, %v3381_v44 }
 0x22f   : > { %2327 = vmatmul.mubr.msk.bf16.vlgmr.msra.gmra.mrb[0].mxu1 %vm520_vm0, %v1358_v16  ;;  %v1360_v33 = vpack.c.bf16 %v1356_v6, %v1355_v29  ;;  %v3121_v16 = vshrl.u32 %v1543_v58, 7 }
 0x230   : > { %2330 = vmatprep.mubr.msk.bf16.mxu1 %vm520_vm0, %v1359_v10  ;;  %v1485_v11 = vpop.permute.xlu1 %1484 }
 0x231   : > { %v1774_v29 = vsub.s32 %v1771_v34, %v3121_v16 }
 0x234   : > { %v1493_v51 = vpop.permute.xlu1 %1492 }
 0x236   : > { %v1481_v18 = vpop.permute.xlu0 %1480 }
 0x237   : > { %2331 = vmatmul.mubr.msk.bf16.gmra.mrb[4].mxu1 %vm520_vm0, %v1360_v33 }
 0x23a   : > { %v1489_v30 = vpop.permute.xlu0 %1488 }
 0x2e8   : > { %v2308_v39 = vpop.f32.mrb[8].mxu0 }
 0x2e9   : > { %v1080_v0 = vpop.f32.mrb[9].mxu0 }
 0x2ea   : > { %v2309_v42 = vpop.f32.mrb[10].mxu0 }
 0x2eb   : > { %v1083_v19 = vpop.f32.mrb[11].mxu0 }
 0x2f9   : > { %v2312_v49 = vpop.f32.mrb[12].mxu0 }
 0x2fa   : > { %v1096_v54 = vpop.f32.mrb[13].mxu0 }
 0x2fb   : > { %v2313_v37 = vpop.f32.mrb[14].mxu0 }
 0x2fc   : > { %v1099_v1 = vpop.f32.mrb[15].mxu0 }
 0x302   : > { %v2328_v52 = vpop.f32.mrb[0].mxu1 }
 0x303   : > { %v2334_v41 = vadd.f32 %v2328_v52, %v2308_v39  ;;  %v1416_v7 = vpop.f32.mrb[1].mxu1 }
 0x304   : > { %v2335_v14 = vadd.f32 %v1416_v7, %v1080_v0  ;;  %v2329_v57 = vpop.f32.mrb[2].mxu1 }
 0x305   : > { %v1497_v12 = vadd.f32 %v2334_v41, %v1485_v11  ;;  %v2336_v15 = vadd.f32 %v2329_v57, %v2309_v42  ;;  %v1419_v45 = vpop.f32.mrb[3].mxu1 }
 0x306   : > { %v1495_v23 = vadd.f32 %v2335_v14, %v1481_v18  ;;  %v2337_v31 = vadd.f32 %v1419_v45, %v1083_v19  ;;  %v2566_v19 = vmov 1934713408  }
 0x307   : > { %v1498_v35 = vadd.f32 %v2336_v15, %v1485_v11  ;;  %v1505_v17 = vmax.f32 %v1497_v12, 0.0 }
 0x308   : > { %v1496_v25 = vadd.f32 %v2337_v31, %v1481_v18  ;;  %v1503_v13 = vmax.f32 %v1495_v23, 0.0 }
 0x309   : > { %v1517_v8 = vsel %vm520_vm0, %v1505_v17, 0.0  ;;  %v1506_v20 = vmax.f32 %v1498_v35, 0.0 }
 0x30a   : > { %1518 = vadd.xlane.f32.xlu0 %v1517_v8  ;;  %v2332_v53 = vpop.f32.mrb[4].mxu1  ;;  %v1504_v3 = vmax.f32 %v1496_v25, 0.0  ;;  %v1511_v47 = vsel %vm520_vm0, %v1503_v13, 0.0 }
 0x30b   : > { %v2338_v40 = vadd.f32 %v2332_v53, %v2312_v49  ;;  %v1432_v50 = vpop.f32.mrb[5].mxu1  ;;  %v1743_v43 = vpack.c.bf16 %v1506_v20, %v1505_v17  ;;  %v1520_v28 = vsel %vm520_vm0, %v1506_v20, 0.0  ;;  %v1801_v49 = vunpack.c.l.s4 %v2566_v19 }
 0x30c   : > { %v2339_v60 = vadd.f32 %v1432_v50, %v1096_v54  ;;  %v2333_v61 = vpop.f32.mrb[6].mxu1  ;;  %v1514_v56 = vsel %vm520_vm0, %v1504_v3, 0.0  ;;  %v1742_v59 = vpack.c.bf16 %v1504_v3, %v1503_v13  ;;  %v1606_v19 = vsub.s32 1, %v3121_v16 }
 0x30d   : > { %v1501_v22 = vadd.f32 %v2338_v40, %v1493_v51  ;;  %v2340_v38 = vadd.f32 %v2333_v61, %v2313_v37  ;;  %v1435_v62 = vpop.f32.mrb[7].mxu1  ;;  %1515 = vadd.xlane.f32.xlu1 %v1514_v56  ;;  %v1751_v63 = vshrl.u32 %v1743_v43, 16  ;;  %v1802_v12 = vunpack.c.0.s8 %v1801_v49 }
 0x30e   : > { %v1499_v55 = vadd.f32 %v2339_v60, %v1489_v30  ;;  %v2341_v4 = vadd.f32 %v1435_v62, %v1099_v1  ;;  %v1750_v46 = vshrl.u32 %v1742_v59, 16  ;;  %1512 = vadd.xlane.f32.xlu0 %v1511_v47  ;;  %v1748_v9 = vpack.i.b16 %v1743_v43, %v1742_v59  ;;  %v1595_v60 = vld [vmem:[%s3329_s5] sm:$0x3] }
 0x30f   : > { %v1502_v27 = vadd.f32 %v2340_v38, %v1493_v51  ;;  %v1509_v10 = vmax.f32 %v1501_v22, 0.0  ;;  %v3156_v3 = vsub.s32 %v1802_v12, %v3121_v16  ;;  %v1599_v61 = vsub.s32 0, %v3121_v16 }
 0x310   : > { %v1500_v5 = vadd.f32 %v2341_v4, %v1489_v30  ;;  %v1752_v2 = vpack.i.b16 %v1751_v63, %v1750_v46  ;;  %v1507_v32 = vmax.f32 %v1499_v55, 0.0  ;;  %v1768_v1 = vcombine.high %v1748_v9, %v1763_v24 }
 0x311   : > { %v1510_v48 = vmax.f32 %v1502_v27, 0.0  ;;  %v3129_v52 = vrot.slane %v1748_v9, %v1774_v29  ;;  %v1529_v18 = vsel %vm520_vm0, %v1509_v10, 0.0  ;;  %v1600_v56 = vrot.slane %v1595_v60, %v1599_v61 }
 0x312   : > { %1521 = vadd.xlane.f32.xlu0 %v1520_v28  ;;  %v1508_v26 = vmax.f32 %v1500_v5, 0.0  ;;  %v1523_v0 = vsel %vm520_vm0, %v1507_v32, 0.0  ;;  %v1834_v41 = vcombine.high %v1752_v2, %v1763_v24  ;;  %v3135_v15 = vrot.slane %v1752_v2, %v1774_v29 }
 0x313   : > { %v1745_v6 = vpack.c.bf16 %v1510_v48, %v1509_v10  ;;  %v1532_v7 = vsel %vm520_vm0, %v1510_v48, 0.0  ;;  %v3141_v35 = vrot.slane %v1768_v1, %v1774_v29  ;;  %v1544_v30 = vand.u32 127, %v1543_v58 }
 0x314   : > { %v1526_v33 = vsel %vm520_vm0, %v1508_v26, 0.0  ;;  %v1744_v39 = vpack.c.bf16 %v1508_v26, %v1507_v32  ;;  %v3149_v13 = vrot.slane %v1834_v41, %v1774_v29  ;;  %v1607_v49 = vrot.slane %v1595_v60, %v1606_v19 }
 0x315   : > { %1527 = vadd.xlane.f32.xlu1 %v1526_v33  ;;  %v1759_v42 = vshrl.u32 %v1745_v6, 16  ;;  %v1549_v38 = vadd.s32 4294967288, %v1544_v30  ;;  %v3178_v63 = vsub.s32 %v1544_v30, %v3121_v16  ;;  %v1674_v60 = vsub.s32 3, %v3121_v16 }
 0x316   : > { %v1758_v54 = vshrl.u32 %v1744_v39, 16  ;;  %1524 = vadd.xlane.f32.xlu0 %v1523_v0  ;;  %v1756_v37 = vpack.i.b16 %v1745_v6, %v1744_v39 }
 0x317   : > { %v1552_v55 = vsub.s32 %v1549_v38, %v3121_v16 }
 0x318   : > { %v1760_v11 = vpack.i.b16 %v1759_v42, %v1758_v54  ;;  %v1783_v14 = vcombine.high %v1756_v37, %v1763_v24  ;;  %v3132_v57 = vrot.slane %v1756_v37, %v1774_v29 }
 0x319   : > { %1533 = vadd.xlane.f32.xlu1 %v1532_v7 }
 0x31a   : > { %1530 = vadd.xlane.f32.xlu0 %v1529_v18  ;;  %v3137_v45 = vrot.slane %v1760_v11, %v1774_v29  ;;  %v1849_v23 = vcombine.high %v1760_v11, %v1763_v24  ;;  %v1798_v31 = vcombine.low %v3129_v52, %v3132_v57  ;;  %v3143_v17 = vrot.slane %v1783_v14, %v1774_v29  ;;  %v2263_v14 = vld [vmem:[%s3330_s6] ss:$0 sm:$0xff] }
 0x31b   : > { %v1799_v25 = vcombine.high %v3129_v52, %v3132_v57  ;;  %v1649_v18 = vld [vmem:[%s3331_s7] sm:$0xf] }
 0x31c   : > { %v1864_v8 = vcombine.low %v3135_v15, %v3137_v45  ;;  %v3151_v20 = vrot.slane %v1849_v23, %v1774_v29  ;;  %v1865_v53 = vcombine.high %v3135_v15, %v3137_v45  ;;  %v1814_v40 = vcombine.low %v3141_v35, %v3143_v17  ;;  %v2000_v52 = vld [vmem:[%s3334_s10] sm:$0xff] }
 0x31d   : > { %v1815_v50 = vcombine.high %v3141_v35, %v3143_v17  ;;  %v1654_v12 = vrot.slane %v1649_v18, %v1599_v61  ;;  %v1661_v23 = vrot.slane %v1649_v18, %v1606_v19 }
 0x31e   : > { %v1880_v43 = vcombine.low %v3149_v13, %v3151_v20  ;;  %v1881_v21 = vcombine.high %v3149_v13, %v3151_v20  ;;  %v1879_v35 = vrot.slane %v1865_v53, %v3156_v3 }
 0x31f   : > { %v3165_v36 = vrot.slane %v1815_v50, %v3156_v3  ;;  %v1667_v50 = vsub.s32 2, %v3121_v16 }
 0x320   : > { %v3170_v51 = vrot.slane %v1881_v21, %v3156_v3 }
 0x321   : > { %v1668_v21 = vrot.slane %v1649_v18, %v1667_v50 }
 0x32a   : > { %1602 = vbcast.lane.b32.xlu1 %v1600_v56, 256  ;;  %v1675_v56 = vrot.slane %v1649_v18, %v1674_v60 }
 0x397   : > { %v1519_v59 = vpop.xlane.xlu0 %1518 }
 0x398   : > { %v1559_v34 = vrot.slane %v1519_v59, %v3178_v63 }
 0x39a   : > { %v1516_v62 = vpop.xlane.xlu1 %1515 }
 0x39b   : > { %v1513_v22 = vpop.xlane.xlu0 %1512  ;;  %v1553_v5 = vrot.slane %v1516_v62, %v1552_v55 }
 0x39c   : > { %v1548_v2 = vrot.slane %v1513_v22, %v3178_v63 }
 0x39e   : > { %v1555_v24 = vsel %vm1554_vm1, %v1553_v5, %v1548_v2 }
 0x39f   : > { %v1522_v47 = vpop.xlane.xlu0 %1521 }
 0x3a0   : > { %v1563_v4 = vrot.slane %v1522_v47, %v1552_v55 }
 0x3a2   : > { %v1528_v46 = vpop.xlane.xlu1 %1527  ;;  %v1564_v28 = vsel %vm1554_vm1, %v1563_v4, %v1559_v34 }
 0x3a3   : > { %v1572_v9 = vrot.slane %v1528_v46, %v1552_v55  ;;  %v1525_v27 = vpop.xlane.xlu0 %1524  ;;  %v1584_v6 = vsel %vm1583_vm2, %v1564_v28, %v1555_v24 }
 0x3a4   : > { %v1568_v58 = vrot.slane %v1525_v27, %v3178_v63 }
 0x3a6   : > { %v1534_v32 = vpop.xlane.xlu1 %1533  ;;  %v1573_v48 = vsel %vm1554_vm1, %v1572_v9, %v1568_v58 }
 0x3a7   : > { %v1581_v10 = vrot.slane %v1534_v32, %v1552_v55  ;;  %v1531_v26 = vpop.xlane.xlu0 %1530  ;;  %v1586_v39 = vsel %vm1585_vm3, %v1573_v48, %v1584_v6  ;;  %v2264_v32 = vld [vmem:[%s3332_s8] ss:$0 sm:$0xff]  ;;  %v1872_v48 = vrot.slane %v1864_v8, %v3156_v3  ;;  %v3223_v8 = vrot.slane %v1814_v40, %v3156_v3 }
 0x3a8   : > { %v1577_v29 = vrot.slane %v1531_v26, %v3178_v63  ;;  %v3215_v26 = vrot.slane %v1798_v31, %v3156_v3  ;;  %v1813_v31 = vrot.slane %v1799_v25, %v3156_v3  ;;  %v1897_v40 = vcombine.high %v1879_v35, %v3381_v44 }
 0x3a9   : > { %v1832_v13 = vcombine.high %v3223_v8, %v3381_v44  ;;  %v1896_v20 = vcombine.high %v1872_v48, %v3381_v44 }
 0x3aa   : > { %v1582_v33 = vsel %vm1554_vm1, %v1581_v10, %v1577_v29  ;;  %v1603_v37 = vpop.permute.xlu1 %1602  ;;  %v1888_v10 = vrot.slane %v1880_v43, %v3156_v3  ;;  %v1830_v24 = vcombine.high %v3215_v26, %v3381_v44  ;;  %v1831_v17 = vcombine.high %v1813_v31, %v3381_v44 }
 0x3ab   : > { %v1588_v0 = vsel %vm1587_vm4, %v1582_v33, %v1586_v39 }
 0x3ac   : > { %v1591_v42 = vsel %vm1590_vm5, %v1588_v0, 0.0 }
 0x3ad   : > { %1592 = vadd.xlane.f32.xlu0 %v1591_v42  ;;  %v1898_v42 = vcombine.high %v1888_v10, %v3381_v44 }
 0x3c3   : > { %1609 = vbcast.lane.b32.xlu0 %v1607_v49, 256 }
 0x3c7   : > { %1644 = vbcast.lane.b32.xlu0 %v2263_v14, 256  ;;  %v1899_v14 = vcombine.high %v3170_v51, %v3381_v44 }
 0x3cb   : > { %1656 = vbcast.lane.b32.xlu0 %v1654_v12, 256 }
 0x3cf   : > { %1663 = vbcast.lane.b32.xlu0 %v1661_v23, 256 }
 0x3d3   : > { %1670 = vbcast.lane.b32.xlu0 %v1668_v21, 256 }
 0x3d7   : > { %1677 = vbcast.lane.b32.xlu0 %v1675_v56, 256 }
 0x43a   : > { %v1593_v54 = vpop.xlane.xlu0 %1592 }
 0x43b   : > { %v1594_v1 = vmul.f32 0.00390625, %v1593_v54 }
 0x43d   : > { %v1613_v41 = vmul.f32 %v1603_v37, %v1594_v1 }
 0x43e   : > { %v1610_v7 = vpop.permute.xlu0 %1609 }
 0x43f   : > { %1618 = vperm.xlu1 %2423, %v1613_v41   ;;  %v1614_v11 = vmul.f32 %v1610_v7, %v1594_v1 }
 0x442   : > { %v1645_v47 = vpop.permute.xlu0 %1644 }
 0x443   : > { %1621 = vperm.xlu1 %2423, %v1614_v11   ;;  %v1833_v11 = vcombine.high %v3165_v36, %v3381_v44 }
 0x446   : > { %v1657_v55 = vpop.permute.xlu0 %1656 }
 0x44a   : > { %v1664_v9 = vpop.permute.xlu0 %1663 }
 0x44e   : > { %v1671_v34 = vpop.permute.xlu0 %1670 }
 0x452   : > { %v1678_v58 = vpop.permute.xlu0 %1677 }
 0x4be   : > { %v1619_v59 = vpop.permute.xlu1 %1618 }
 0x4bf   : > { %v1626_v22 = vrot.slane %v1619_v59, %v3178_v63 }
 0x4c2   : > { %v1622_v30 = vpop.permute.xlu1 %1621 }
 0x4c3   : > { %v1630_v38 = vrot.slane %v1622_v30, %v3178_v63 }
 0x4c5   : > { %v1631_v61 = vsel %vm1583_vm2, %v1630_v38, %v1626_v22 }
 0x4c6   : > { %v1634_v62 = vsel %vm1633_vm6, %v1631_v61, 0.0 }
 0x4c7   : > { %1635 = vadd.xlane.f32.xlu1 %v1634_v62 }
 0x554   : > { %v1636_v4 = vpop.xlane.xlu1 %1635 }
 0x555   : > { %v1647_v46 = vadd.f32 %v1645_v47, %v1636_v4 }
 0x557   : > { %v1648_v16 = vmax.f32 %v1647_v46, 0.0 }
 0x559   : > { %v1683_v27 = vmul.f32 %v1657_v55, %v1648_v16  ;;  %v1684_v5 = vmul.f32 %v1664_v9, %v1648_v16  ;;  %v1685_v2 = vmul.f32 %v1671_v34, %v1648_v16  ;;  %v1686_v28 = vmul.f32 %v1678_v58, %v1648_v16  ;;  %v1978_v34 = vld [vmem:[%s3333_s9] sm:$0xff] }
 0x55b   : > { %1692 = vperm.xlu0 %2422, %v1683_v27  }
 0x55f   : > { %1695 = vperm.xlu0 %2422, %v1684_v5  }
 0x563   : > { %1698 = vperm.xlu0 %2422, %v1685_v2  }
 0x567   : > { %1701 = vperm.xlu0 %2422, %v1686_v28  }
 0x56b   : > { %1734 = vbcast.lane.b32.xlu0 %v2264_v32, 256 }
 0x56f   : > { %1901 = vrot.lane.b32.xlu0 %v1872_v48, %s2567_s29 }
 0x573   : > { %1922 = vrot.lane.b32.xlu0 %v1888_v10, %s2567_s29  ;;  %s2075_s29 = sshll.u32 %s409_s15, 4  ;;  %s3284_s29 = int_to_ptr.vmem [resolvable:$true] %s2075_s29 }
 0x577   : > { %1904 = vrot.lane.b32.xlu0 %v1830_v24, %s2568_s16 }
 0x57b   : > { %1925 = vrot.lane.b32.xlu0 %v1832_v13, %s2568_s16 }
 0x57f   : > { %1907 = vrot.lane.b32.xlu0 %v1896_v20, %s2569_s22 }
 0x583   : > { %1910 = vrot.lane.b32.xlu0 %v1813_v31, %s2570_s19 }
 0x587   : > { %1913 = vrot.lane.b32.xlu0 %v1879_v35, %s2571_s26 }
 0x58b   : > { %1916 = vrot.lane.b32.xlu0 %v1831_v17, %s2572_s24 }
 0x58f   : > { %1919 = vrot.lane.b32.xlu0 %v1897_v40, %s2573_s25 }
 0x593   : > { %2003 = vperm.xlu0 %2422, %v2000_v52  }
 0x5da   : > { %v1693_v57 = vpop.permute.xlu0 %1692 }
 0x5db   : > { %v1706_v3 = vrot.slane %v1693_v57, %v3178_v63 }
 0x5de   : > { %v1696_v15 = vpop.permute.xlu0 %1695 }
 0x5df   : > { %v1710_v25 = vrot.slane %v1696_v15, %v3178_v63 }
 0x5e1   : > { %v1719_v29 = vsel %vm1583_vm2, %v1710_v25, %v1706_v3 }
 0x5e2   : > { %v1699_v45 = vpop.permute.xlu0 %1698 }
 0x5e3   : > { %v1714_v53 = vrot.slane %v1699_v45, %v3178_v63 }
 0x5e5   : > { %v1720_v33 = vsel %vm1585_vm3, %v1714_v53, %v1719_v29 }
 0x5e6   : > { %v1702_v43 = vpop.permute.xlu0 %1701 }
 0x5e7   : > { %v1718_v6 = vrot.slane %v1702_v43, %v3178_v63 }
 0x5e9   : > { %v1721_v39 = vsel %vm1587_vm4, %v1718_v6, %v1720_v33 }
 0x5ea   : > { %v1724_v0 = vsel %vm1723_vm7, %v1721_v39, 0.0  ;;  %v1735_v19 = vpop.permute.xlu0 %1734 }
 0x5eb   : > { %1725 = vadd.xlane.f32.xlu1 %v1724_v0 }
 0x5ee   : > { %v1902_v18 = vpop.permute.xlu0 %1901 }
 0x5ef   : > { %v1944_v61 = vsel %vm520_vm0, %v3215_v26, %v1902_v18 }
 0x5f2   : > { %v1923_v12 = vpop.permute.xlu0 %1922 }
 0x5f6   : > { %v1905_v23 = vpop.permute.xlu0 %1904 }
 0x5f7   : > { %v1947_v44 = vsel %vm1945_vm8, %v1944_v61, %v1905_v23 }
 0x5fa   : > { %v1926_v50 = vpop.permute.xlu0 %1925 }
 0x5fc   : > { %1928 = vrot.lane.b32.xlu1 %v1898_v42, %s2569_s22 }
 0x5fe   : > { %v1908_v21 = vpop.permute.xlu0 %1907 }
 0x5ff   : > { %v1950_v62 = vsel %vm1948_vm9, %v1947_v44, %v1908_v21 }
 0x600   : > { %1931 = vrot.lane.b32.xlu1 %v3165_v36, %s2570_s19  ;;  %s3282_s19 = scalar_lea.hbm %s3335_s11, %s2273_s13 }
 0x602   : > { %v1911_v56 = vpop.permute.xlu0 %1910 }
 0x603   : > { %v1953_v55 = vsel %vm1951_vm10, %v1950_v62, %v1911_v56 }
 0x604   : > { %1934 = vrot.lane.b32.xlu1 %v3170_v51, %s2571_s26  ;;  %v1965_v51 = vsel %vm520_vm0, %v3223_v8, %v1923_v12  ;;  %s2488_s26 = scalar_lea.vmem %s3284_s29, 256 }
 0x605   : > { %v1967_v47 = vsel %vm1945_vm8, %v1965_v51, %v1926_v50  ;;  %p2489_p12 = scmp.ne.s32.totalorder %s3284_s29, %s2488_s26 }
 0x606   : > { %v1914_v30 = vpop.permute.xlu0 %1913 }
 0x607   : > { %v1956_v16 = vsel %vm1954_vm11, %v1953_v55, %v1914_v30  ;;  %p2490_p2 = pnand %p2489_p12, %p3385_p1 }
 0x609   : > { %p2491_p3 = pneg %p2490_p2 }
 0x60a   : > { %v1917_v38 = vpop.permute.xlu0 %1916 }
 0x60b   : > { %v1959_v5 = vsel %vm1957_vm12, %v1956_v16, %v1917_v38 }
 0x60e   : > { %v1920_v4 = vpop.permute.xlu0 %1919 }
 0x60f   : > { %v1962_v58 = vsel %vm1960_vm13, %v1959_v5, %v1920_v4 }
 0x610   : > { %v2011_v26 = vsel %vm2010_vm14, %v1962_v58, 0 }
 0x612   : > { %v2004_v8 = vpop.permute.xlu0 %2003 }
 0x678   : > { %v1726_v49 = vpop.xlane.xlu1 %1725 }
 0x679   : > { %v1737_v54 = vadd.f32 %v1735_v19, %v1726_v49 }
 0x67b   : > { %v1738_v37 = vmul.f32 0.16666667, %v1737_v54 }
 0x67c   : > { %v1929_v60 = vpop.permute.xlu1 %1928 }
 0x67d   : > { %v1739_v1 = vadd.f32 0.5, %v1738_v37  ;;  %v1969_v27 = vsel %vm1948_vm9, %v1967_v47, %v1929_v60 }
 0x67f   : > { %v1740_v41 = vmax.f32 %v1739_v1, 0.0 }
 0x680   : > { %v1932_v59 = vpop.permute.xlu1 %1931 }
 0x681   : > { %v1741_v7 = vmin.f32 %v1740_v41, 1.0  ;;  %v1971_v2 = vsel %vm1951_vm10, %v1969_v27, %v1932_v59 }
 0x683   : > { %1981 = vperm.xlu1 %2423, %v1741_v7  }
 0x684   : > { %v1935_v22 = vpop.permute.xlu1 %1934 }
 0x685   : > { %v1973_v28 = vsel %vm1954_vm11, %v1971_v2, %v1935_v22 }
 0x687   : > { %1937 = vrot.lane.b32.xlu1 %v1833_v11, %s2572_s24  ;;  %s2574_s24 = smov [#allocation7]  }
 0x68b   : > { %1940 = vrot.lane.b32.xlu1 %v1899_v14, %s2573_s25  ;;  %s2492_s25 = sshll.u32 %s2574_s24, 4  ;;  %s2493_s25 = int_to_ptr.vmem [resolvable:$false] %s2492_s25 }
 0x68c   : > { %s2494_s30 = scalar_lea.vmem %s2493_s25, 512  ;;  %p2495_p4 = scmp.lt.s32.totalorder %s3284_s29, %s2493_s25 }
 0x68d   : > { %p2496_p7 = scmp.lt.s32.totalorder %s2494_s30, %s2488_s26 }
 0x68f   : > { %p2497_p8 = por %p2496_p7, %p2495_p4 }
 0x691   : > { %p2498_p11 = pnand %p2497_p8, %p2491_p3 }
 0x702   : > { %v1982_v36 = vpop.permute.xlu1 %1981 }
 0x703   : > { %v1986_v46 = vrot.slane %v1982_v36, %v3178_v63 }
 0x705   : > { %v1998_v32 = vmul.f32 %v1986_v46, %v1978_v34 }
 0x706   : > { %v1938_v9 = vpop.permute.xlu1 %1937 }
 0x707   : > { %v1975_v63 = vsel %vm1957_vm12, %v1973_v28, %v1938_v9  ;;  %v1999_v24 = vpack.c.bf16 %v1998_v32, %v1998_v32 }
 0x70a   : > { %v1941_v48 = vpop.permute.xlu1 %1940 }
 0x70b   : > { %v1977_v10 = vsel %vm1960_vm13, %v1975_v63, %v1941_v48 }
 0x70c   : > { %2265 = vmatprep.subr.msk.bf16.mxu0 %vm2010_vm14, %v1977_v10 }
 0x70d   : > { %2016 = vmatpush1.bf16.msra.mxu0 %v2011_v26 }
 0x710   : > { %2266 = vmatmul.mubr.msk.bf16.vlgmr.msra.gmra.mrb[16].mxu0 %vm2006_vm15, %v1999_v24 }
 0x7e3   : > { %v2049_v13 = vpop.f32.mrb[16].mxu0 }
 0x7e4   : > { %v2050_v20 = vadd.f32 %v2049_v13, %v2004_v8  ;;  %v2051_v31 = vpop.f32.mrb[17].mxu0 }
 0x7e5   : > { %v2052_v35 = vadd.f32 %v2051_v31, %v2004_v8  ;;  %v2053_v17 = vpop.f32.mrb[18].mxu0 }
 0x7e6   : > { %v2056_v40 = vmax.f32 %v2050_v20, 0.0  ;;  %v2054_v52 = vpop.f32.mrb[19].mxu0 }
 0x7e7   : > { %v2057_v57 = vmax.f32 %v2052_v35, 0.0 }
 0x7e8   : > { %2058 = vst [vmem:[%s409_s15] sm:$0xff] %v2056_v40 }
 0x7e9   : > { %2059 = vst [vmem:[%s409_s15 + $0x8] sm:$0xff] %v2057_v57 }
 0x7ea   : > { %2501 = shalt.err (!%p2498_p11)
}
 0x7eb   : > { %s2502_s14 = scalar_lea.hbm %s3282_s19, 256  ;;  %s2506_s23 = scalar_lea.hbm %s3335_s11, 512 }
 0x7ec   : > { %p2503_p13 = scmp.ne.s32.totalorder %s3282_s19, %s2502_s14  ;;  %p2507_p6 = scmp.lt.u32.totalorder %s3282_s19, %s3335_s11 }
 0x7ed   : > { %p2508_p9 = scmp.lt.u32.totalorder %s2506_s23, %s2502_s14  ;;  %p2510_p12 = scmp.lt.u32.totalorder %s2502_s14, %s3282_s19 }
 0x7ee   : > { %p2504_p5 = pnand %p2503_p13, %p3385_p1 }
 0x7ef   : > { %p2509_p10 = por %p2508_p9, %p2507_p6 }
 0x7f0   : > { %p2505_p0 = pneg %p2504_p5 }
 0x7f1   : > { %p2511_p2 = por %p2510_p12, %p2509_p10 }
 0x7f3   : > { %p2512_p3 = pnand %p2511_p2, %p2505_p0 }
 0x7f5   : > { %2515 = shalt.err (!%p2512_p3)
}
 0x7f6   : > { %2358 = dma.vmem_to_hbm [thread:$0]  (%p3385_p1), %s3284_s29, 256, %s3282_s19, %s2061_s21  }
 0x7f7 PF: > { %s3386_s15 = sld [smem:[#allocation11_spill]]  ;;  %s3387_s16 = sld [smem:[#allocation15_spill]] }
 0x7f8   : > { %p2375_p4 = scmp.ge.s32.totalorder %s2558_s20, 2 }
 0x7fd   : > { %s2087_s22 = sand.u32 1, %s3386_s15   ;;  %p3388_p7 = scmp.ne.s32.totalorder %s3387_s16, 0 }
 0x7fe   : > { %s2088_s26 = scalar_lea.sflag [#allocation4], %s2087_s22 }
 0x7ff   : > { %p2368_p8 = pnand %p2375_p4, %p3388_p7 }
 0x801   : > { %2541 = dma.done.wait (!%p2368_p8), %s2088_s26, 256  }
 0x802   : > { %2543 = vsyncadd (!%p2368_p8), %s2088_s26, 4294967040  ;;  %s3389_s20 = sld [smem:[#allocation13_spill]]  ;;  %s3390_s24 = sld [smem:[#allocation12_spill]] }
 0x803   : > { %s3391_s19 = sld [smem:[#allocation14_spill]]  ;;  %s3392_s17 = smov %s2550_s18 }
 0x808   : > { %p23_p11 = scmp.ge.s32.totalorder %s3389_s20, 4   ;;  %s3393_s18 = smov %s3390_s24 }
 0x80a   :  { %25 = sbr.rel (!%p23_p11) target bundleno = 5 (0x5), region = 118 }
 0x811   :  { %2093 = vsyncpa [#allocation3], 1 }
 0x812   :  { %2095 = vsyncpa [#allocation3 + $0x1], 1 }
 0x813   :  { %2096 = vsyncpa [#allocation6], 1 }
 0x814   :  { %2097 = vsyncpa [#allocation4], 1 }
 0x815   :  { %2099 = vsyncpa [#allocation4 + $0x1], 1 }

</bundles_post_ra>
